<compile_context>
chip_gen: v5e
topology: v5e:2x2
jax: 0.10.0
libtpu: 0.0.40
codegen_flags: <defaults>
</compile_context>

<pallas_src>
import numpy as np
import jax
import jax.numpy as jnp
from jax.experimental import pallas as pl
from jax.experimental.pallas import tpu as pltpu


# ----------------------------------------------------------------------------
# Wrapper-side constant construction (plain JAX / numpy, tiny)
# ----------------------------------------------------------------------------
def _banded_conv_rhs(w, w_out, pad):
    """w: (kh, kw, cin, cout) f32 -> banded matrix (kh*Wp*cin, W*cout).

    rhs[(di, wj, ci), (w, co)] = w[di, wj - w, ci, co]  if 0 <= wj - w < kw else 0
    so that  lhs_row(n,h) @ rhs  is the cross-correlation conv with padding=pad.
    """
    kh, kw, cin, cout = w.shape
    wp = w_out + 2 * pad
    wj = np.arange(wp)[:, None]                 # padded input column
    wo = np.arange(w_out)[None, :]              # output column
    dj = wj - wo                                # kernel tap index
    valid = ((dj >= 0) & (dj < kw)).astype(np.float32)
    djc = np.clip(dj, 0, kw - 1)
    g = w[:, djc, :, :]                         # (kh, Wp, W, cin, cout)
    g = g * jnp.asarray(valid)[None, :, :, None, None]
    g = jnp.transpose(g, (0, 1, 3, 2, 4))       # (kh, Wp, cin, W, cout)
    return g.reshape(kh * wp * cin, w_out * cout)


# ----------------------------------------------------------------------------
# Fused conv + bias + BatchNorm(batch stats) + ReLU (+ residual) kernel
# ----------------------------------------------------------------------------
def _make_layer_kernel(N, H, kh, Lin, Lout, inv_cnt, has_res):
    NH = N * H

    def kernel(*refs):
        if has_res:
            xp_ref, rhs_ref, pp_ref, sel_ref, res_ref, o_ref = refs
        else:
            xp_ref, rhs_ref, pp_ref, sel_ref, o_ref = refs
            res_ref = None

        xp = xp_ref[...]                                     # (N, Hp, Lin) bf16
        # K-concatenated lhs: one row per output row (n, h).  The kw taps live
        # in the banded rhs; the kh taps are a lane-concat of kh row-shifted
        # slabs (static slices of the VMEM-resident padded slab).
        slabs = [xp[:, di:di + H, :].reshape(NH, Lin) for di in range(kh)]
        lhs = slabs[0] if kh == 1 else jnp.concatenate(slabs, axis=-1)

        # One MXU matmul for the whole batch; lane-dense (W*Cout) result.
        acc = jnp.dot(lhs, rhs_ref[...], preferred_element_type=jnp.float32)
        acc = acc + pp_ref[0:1, :]                           # conv bias (pre-widened)

        # BatchNorm batch statistics, kept lane-dense: row-reduce, then one tiny
        # matmul with the channel-group projector sums over the W positions and
        # broadcasts the per-channel totals back onto every lane.
        s1 = jnp.dot(jnp.sum(acc, axis=0, keepdims=True), sel_ref[...],
                     preferred_element_type=jnp.float32)     # (1, Lout)
        s2 = jnp.dot(jnp.sum(acc * acc, axis=0, keepdims=True), sel_ref[...],
                     preferred_element_type=jnp.float32)     # (1, Lout)
        mean = s1 * inv_cnt
        var = jnp.maximum(s2 * inv_cnt - mean * mean, 0.0)   # biased batch var
        scale = pp_ref[1:2, :] * jax.lax.rsqrt(var + 1e-5)   # gamma / sqrt(var+eps)
        shift = pp_ref[2:3, :] - mean * scale                # beta - mean*scale

        out = jnp.maximum(acc * scale + shift, 0.0)          # BN affine + ReLU
        out = out.reshape(N, H, Lout)
        if has_res:
            out = out + res_ref[...].astype(jnp.float32)     # residual AFTER act
        o_ref[...] = out.astype(o_ref.dtype)

    return kernel


def cna_forward(p, x, residual=None):
    """One fused conv_norm_act layer.

    x        : (N, H, W*Cin)  bf16, lane-dense (w-major, c-minor lanes)
    residual : (N, H, W*Cout) bf16 or None; added AFTER the activation
    returns  : (N, H, W*Cout) bf16
    """
    w = p['w']                                   # (kh, kw, cin, cout) f32
    kh, kw, cin, cout = w.shape
    N, H, L = x.shape
    assert L % cin == 0
    W = L // cin
    assert H % 8 == 0, "H must be a sublane multiple for the in-kernel reshapes"
    pad = kh // 2
    Hp, Wp = H + 2 * pad, W + 2 * pad
    Lin, Lout = Wp * cin, W * cout

    # Spatial zero-pad (cheap XLA op); in the lane-dense layout the width pad is
    # just pad*cin zero lanes on each side (lanes are w-major, c-minor).
    xp = x if pad == 0 else jnp.pad(x, ((0, 0), (pad, pad), (pad * cin, pad * cin)))

    # Banded conv weights -> single lane-dense MXU matmul per layer.
    rhs = _banded_conv_rhs(w, W, pad).astype(jnp.bfloat16)

    # Pre-widened per-channel params [bias; gamma; beta] tiled to (3, W*Cout),
    # and the channel-group projector P[l, l'] = (l % cout == l' % cout).
    pp = jnp.stack([jnp.tile(p['b'], W), jnp.tile(p['gamma'], W),
                    jnp.tile(p['beta'], W)], axis=0).astype(jnp.float32)
    lane_ch = np.arange(Lout) % cout
    sel = jnp.asarray(np.equal.outer(lane_ch, lane_ch).astype(np.float32))

    in_specs = [
        pl.BlockSpec((N, Hp, Lin), lambda i: (0, 0, 0)),
        pl.BlockSpec((kh * Lin, Lout), lambda i: (0, 0)),
        pl.BlockSpec((3, Lout), lambda i: (0, 0)),
        pl.BlockSpec((Lout, Lout), lambda i: (0, 0)),
    ]
    args = [xp, rhs, pp, sel]
    if residual is not None:
        in_specs.append(pl.BlockSpec((N, H, Lout), lambda i: (0, 0, 0)))
        args.append(residual)

    kernel = _make_layer_kernel(N, H, kh, Lin, Lout,
                                1.0 / float(N * H * W), residual is not None)
    return pl.pallas_call(
        kernel,
        out_shape=jax.ShapeDtypeStruct((N, H, Lout), jnp.bfloat16),
        grid=(1,),
        in_specs=in_specs,
        out_specs=pl.BlockSpec((N, H, Lout), lambda i: (0, 0, 0)),
        compiler_params=pltpu.CompilerParams(
            dimension_semantics=("arbitrary",)),
    )(*args)


# ----------------------------------------------------------------------------
# EncoderBlock forward (NHWC/lane-dense internally, NCHW at the boundary)
# ----------------------------------------------------------------------------
def encoder_block_forward(params, x_nhwc, pool=True):
    if pool:
        N, H, W, C = x_nhwc.shape
        x_nhwc = x_nhwc.reshape(N, H // 2, 2, W // 2, 2, C).max(axis=(2, 4))
    N, H, W, C = x_nhwc.shape
    x = x_nhwc.reshape(N, H, W * C).astype(jnp.bfloat16)      # lane-dense

    proj = cna_forward(params['conv0'], x)
    h = cna_forward(params['conv1'], x)
    h = cna_forward(params['conv2'], h, residual=proj)        # proj + act(conv2(.))
    t = cna_forward(params['conv3'], h)
    h = cna_forward(params['conv4'], t, residual=h)           # h + act(conv4(conv3(h)))

    cout = params['conv4']['gamma'].shape[0]
    return h.reshape(N, H, W, cout)


def encoder_forward(params, x_nchw, pool=True):
    x = jnp.transpose(x_nchw, (0, 2, 3, 1))                   # NCHW -> NHWC (f32)
    h = encoder_block_forward(params, x, pool=pool)
    return jnp.transpose(h.astype(jnp.float32), (0, 3, 1, 2)) # NHWC -> NCHW


# ----------------------------------------------------------------------------
# Matched-precision pure-JAX reference (for an in-script correctness check)
# ----------------------------------------------------------------------------
def _cna_ref(p, x, residual=None):
    w = p['w'].astype(jnp.bfloat16)
    y = jax.lax.conv_general_dilated(
        x, w, window_strides=(1, 1), padding='SAME',
        dimension_numbers=('NHWC', 'HWIO', 'NHWC'),
        preferred_element_type=jnp.float32)
    y = y + p['b']
    mean = jnp.mean(y, axis=(0, 1, 2))
    var = jnp.mean(jnp.square(y - mean), axis=(0, 1, 2))
    out = jnp.maximum(p['gamma'] * (y - mean) * jax.lax.rsqrt(var + 1e-5)
                      + p['beta'], 0.0)
    if residual is not None:
        out = out + residual.astype(jnp.float32)
    return out.astype(jnp.bfloat16)


def encoder_forward_ref(params, x_nchw, pool=True):
    x = jnp.transpose(x_nchw, (0, 2, 3, 1))
    if pool:
        N, H, W, C = x.shape
        x = x.reshape(N, H // 2, 2, W // 2, 2, C).max(axis=(2, 4))
    x = x.astype(jnp.bfloat16)
    proj = _cna_ref(params['conv0'], x)
    h = _cna_ref(params['conv1'], x)
    h = _cna_ref(params['conv2'], h, residual=proj)
    t = _cna_ref(params['conv3'], h)
    h = _cna_ref(params['conv4'], t, residual=h)
    return jnp.transpose(h.astype(jnp.float32), (0, 3, 1, 2))


# ----------------------------------------------------------------------------
# Deterministic synthetic parameters (match the module's shapes)
# ----------------------------------------------------------------------------
def init_cna(key, cin, cout, ksize):
    ks = jax.random.split(key, 4)
    fan_in = cin * ksize * ksize
    w_torch = jax.random.normal(ks[0], (cout, cin, ksize, ksize),
                                jnp.float32) / np.sqrt(fan_in)
    return dict(
        w=jnp.transpose(w_torch, (2, 3, 1, 0)),     # (kh, kw, cin, cout) f32
        b=0.01 * jax.random.normal(ks[1], (cout,), jnp.float32),
        gamma=1.0 + 0.1 * jax.random.normal(ks[2], (cout,), jnp.float32),
        beta=0.1 * jax.random.normal(ks[3], (cout,), jnp.float32),
    )


def init_encoder_block(key, cin, cout):
    ks = jax.random.split(key, 5)
    return dict(
        conv0=init_cna(ks[0], cin, cout, 1),
        conv1=init_cna(ks[1], cin, cout, 3),
        conv2=init_cna(ks[2], cout, cout, 3),
        conv3=init_cna(ks[3], cout, cout, 3),
        conv4=init_cna(ks[4], cout, cout, 3),
    )


# ----------------------------------------------------------------------------
if __name__ == "__main__":
    key = jax.random.PRNGKey(0)
    kp, kx = jax.random.split(key)

    batch, in_channels, out_channels, spatial = 2, 4, 16, 16
    params = init_encoder_block(kp, in_channels, out_channels)
    x = jax.random.normal(kx, (batch, in_channels, spatial, spatial),
                          jnp.float32)               # NCHW, like PyTorch

    fwd = jax.jit(encoder_forward, static_argnames=("pool",))
    out = jax.block_until_ready(fwd(params, x, pool=True))

    assert out.shape == (batch, out_channels, spatial // 2, spatial // 2), out.shape
    assert bool(jnp.all(jnp.isfinite(out)))

    # Self-check against a matched-precision pure-JAX reference (bf16 operands,
    # f32 accumulation and batch statistics, identical cast points).
    ref = jax.block_until_ready(
        jax.jit(encoder_forward_ref, static_argnames=("pool",))(params, x, pool=True))
    max_err = float(jnp.max(jnp.abs(out - ref)))
    assert max_err < 0.15, f"kernel/reference mismatch: max abs err = {max_err}"

    print("KERNEL_OK")
</pallas_src>

<mosaic_0001>
module attributes {stable_mosaic.version = 11 : i64} {
  func.func @kernel(%arg0: i32, %arg1: memref<2x10x40xbf16, #tpu.memory_space<vmem>>, %arg2: memref<120x128xbf16, #tpu.memory_space<vmem>>, %arg3: memref<3x128xf32, #tpu.memory_space<vmem>>, %arg4: memref<128x128xf32, #tpu.memory_space<vmem>>, %arg5: memref<2x8x128xbf16, #tpu.memory_space<vmem>>) attributes {dimension_semantics = [#tpu.dimension_semantics<arbitrary>], iteration_bounds = array<i64: 1>, scalar_prefetch = 0 : i64, scratch_operands = 0 : i64, tpu.core_type = #tpu.core_type<tc>, window_params = [{pipeline_mode = #tpu.pipeline_mode<synchronous>, transform_indices = @transform_0, window_bounds = array<i64: 2, 10, 40>}, {pipeline_mode = #tpu.pipeline_mode<synchronous>, transform_indices = @transform_1, window_bounds = array<i64: 120, 128>}, {pipeline_mode = #tpu.pipeline_mode<synchronous>, transform_indices = @transform_2, window_bounds = array<i64: 3, 128>}, {pipeline_mode = #tpu.pipeline_mode<synchronous>, transform_indices = @transform_3, window_bounds = array<i64: 128, 128>}, {pipeline_mode = #tpu.pipeline_mode<synchronous>, transform_indices = @transform_4, window_bounds = array<i64: 2, 8, 128>}]} {
    %c0 = arith.constant 0 : index
    %c0_0 = arith.constant 0 : index
    %c0_1 = arith.constant 0 : index
    %0 = vector.load %arg1[%c0, %c0_0, %c0_1] : memref<2x10x40xbf16, #tpu.memory_space<vmem>>, vector<2x10x40xbf16>
    %1 = vector.extract_strided_slice %0 {offsets = [0, 0, 0], sizes = [2, 8, 40], strides = [1, 1, 1]} : vector<2x10x40xbf16> to vector<2x8x40xbf16>
    %2 = vector.shape_cast %1 : vector<2x8x40xbf16> to vector<16x40xbf16>
    %3 = vector.extract_strided_slice %0 {offsets = [0, 1, 0], sizes = [2, 8, 40], strides = [1, 1, 1]} : vector<2x10x40xbf16> to vector<2x8x40xbf16>
    %4 = vector.shape_cast %3 : vector<2x8x40xbf16> to vector<16x40xbf16>
    %5 = vector.extract_strided_slice %0 {offsets = [0, 2, 0], sizes = [2, 8, 40], strides = [1, 1, 1]} : vector<2x10x40xbf16> to vector<2x8x40xbf16>
    %6 = vector.shape_cast %5 : vector<2x8x40xbf16> to vector<16x40xbf16>
    %7 = tpu.concatenate %2, %4, %6 in 1 : vector<16x40xbf16>, vector<16x40xbf16>, vector<16x40xbf16> -> vector<16x120xbf16>
    %c0_2 = arith.constant 0 : index
    %c0_3 = arith.constant 0 : index
    %8 = vector.load %arg2[%c0_2, %c0_3] : memref<120x128xbf16, #tpu.memory_space<vmem>>, vector<120x128xbf16>
    %cst = arith.constant dense<0.000000e+00> : vector<16x128xf32>
    %9 = tpu.matmul %7, %8, %cst {dimension_numbers = #tpu.dot_dimension_numbers<[1], [0], [0], [1], [0, 0, 1, 1], [], []>} : vector<16x120xbf16>, vector<120x128xbf16>, vector<16x128xf32> -> vector<16x128xf32>
    %c0_4 = arith.constant 0 : index
    %c0_5 = arith.constant 0 : index
    %10 = vector.load %arg3[%c0_4, %c0_5] : memref<3x128xf32, #tpu.memory_space<vmem>>, vector<1x128xf32>
    %11 = vector.broadcast %10 : vector<1x128xf32> to vector<16x128xf32>
    %12 = arith.addf %9, %11 : vector<16x128xf32>
    %cst_6 = arith.constant dense<0.000000e+00> : vector<128xf32>
    %13 = vector.multi_reduction <add>, %12, %cst_6 [0] : vector<16x128xf32> to vector<128xf32>
    %14 = vector.shape_cast %13 : vector<128xf32> to vector<1x128xf32>
    %c0_7 = arith.constant 0 : index
    %c0_8 = arith.constant 0 : index
    %15 = vector.load %arg4[%c0_7, %c0_8] : memref<128x128xf32, #tpu.memory_space<vmem>>, vector<128x128xf32>
    %cst_9 = arith.constant dense<0.000000e+00> : vector<1x128xf32>
    %16 = tpu.matmul %14, %15, %cst_9 {dimension_numbers = #tpu.dot_dimension_numbers<[1], [0], [0], [1], [0, 0, 1, 1], [], []>} : vector<1x128xf32>, vector<128x128xf32>, vector<1x128xf32> -> vector<1x128xf32>
    %17 = arith.mulf %12, %12 : vector<16x128xf32>
    %cst_10 = arith.constant dense<0.000000e+00> : vector<128xf32>
    %18 = vector.multi_reduction <add>, %17, %cst_10 [0] : vector<16x128xf32> to vector<128xf32>
    %19 = vector.shape_cast %18 : vector<128xf32> to vector<1x128xf32>
    %c0_11 = arith.constant 0 : index
    %c0_12 = arith.constant 0 : index
    %20 = vector.load %arg4[%c0_11, %c0_12] : memref<128x128xf32, #tpu.memory_space<vmem>>, vector<128x128xf32>
    %cst_13 = arith.constant dense<0.000000e+00> : vector<1x128xf32>
    %21 = tpu.matmul %19, %20, %cst_13 {dimension_numbers = #tpu.dot_dimension_numbers<[1], [0], [0], [1], [0, 0, 1, 1], [], []>} : vector<1x128xf32>, vector<128x128xf32>, vector<1x128xf32> -> vector<1x128xf32>
    %cst_14 = arith.constant 7.812500e-03 : f32
    %22 = vector.broadcast %cst_14 : f32 to vector<1x128xf32>
    %23 = arith.mulf %16, %22 : vector<1x128xf32>
    %cst_15 = arith.constant 7.812500e-03 : f32
    %24 = vector.broadcast %cst_15 : f32 to vector<1x128xf32>
    %25 = arith.mulf %21, %24 : vector<1x128xf32>
    %26 = arith.mulf %23, %23 : vector<1x128xf32>
    %27 = arith.subf %25, %26 : vector<1x128xf32>
    %cst_16 = arith.constant 0.000000e+00 : f32
    %28 = vector.broadcast %cst_16 : f32 to vector<1x128xf32>
    %29 = arith.maximumf %27, %28 : vector<1x128xf32>
    %c1 = arith.constant 1 : index
    %c0_17 = arith.constant 0 : index
    %30 = vector.load %arg3[%c1, %c0_17] : memref<3x128xf32, #tpu.memory_space<vmem>>, vector<1x128xf32>
    %cst_18 = arith.constant 9.99999974E-6 : f32
    %31 = vector.broadcast %cst_18 : f32 to vector<1x128xf32>
    %32 = arith.addf %29, %31 : vector<1x128xf32>
    %33 = math.rsqrt %32 : vector<1x128xf32>
    %34 = arith.mulf %30, %33 : vector<1x128xf32>
    %c2 = arith.constant 2 : index
    %c0_19 = arith.constant 0 : index
    %35 = vector.load %arg3[%c2, %c0_19] : memref<3x128xf32, #tpu.memory_space<vmem>>, vector<1x128xf32>
    %36 = arith.mulf %23, %34 : vector<1x128xf32>
    %37 = arith.subf %35, %36 : vector<1x128xf32>
    %38 = vector.broadcast %34 : vector<1x128xf32> to vector<16x128xf32>
    %39 = arith.mulf %12, %38 : vector<16x128xf32>
    %40 = vector.broadcast %37 : vector<1x128xf32> to vector<16x128xf32>
    %41 = arith.addf %39, %40 : vector<16x128xf32>
    %cst_20 = arith.constant 0.000000e+00 : f32
    %42 = vector.broadcast %cst_20 : f32 to vector<16x128xf32>
    %43 = arith.maximumf %41, %42 : vector<16x128xf32>
    %44 = vector.shape_cast %43 : vector<16x128xf32> to vector<2x8x128xf32>
    %45 = arith.truncf %44 : vector<2x8x128xf32> to vector<2x8x128xbf16>
    %c0_21 = arith.constant 0 : index
    %c0_22 = arith.constant 0 : index
    %c0_23 = arith.constant 0 : index
    %46 = vector.load %arg5[%c0_21, %c0_22, %c0_23] : memref<2x8x128xbf16, #tpu.memory_space<vmem>>, vector<2x8x128xbf16>
    tpu.vector_store %arg5[%c0_21, %c0_22, %c0_23], %45 {strides = array<i32>} : memref<2x8x128xbf16, #tpu.memory_space<vmem>>, vector<2x8x128xbf16>,
    return
  }
  func.func @transform_0(%arg0: i32) -> (i32, i32, i32) {
    %c0_i32 = arith.constant 0 : i32
    %c0_i32_0 = arith.constant 0 : i32
    %c0_i32_1 = arith.constant 0 : i32
    %c0_i32_2 = arith.constant 0 : i32
    return %c0_i32, %c0_i32_0, %c0_i32_1 : i32, i32, i32
  }
  func.func @transform_1(%arg0: i32) -> (i32, i32) {
    %c0_i32 = arith.constant 0 : i32
    %c0_i32_0 = arith.constant 0 : i32
    %c0_i32_1 = arith.constant 0 : i32
    return %c0_i32, %c0_i32_0 : i32, i32
  }
  func.func @transform_2(%arg0: i32) -> (i32, i32) {
    %c0_i32 = arith.constant 0 : i32
    %c0_i32_0 = arith.constant 0 : i32
    %c0_i32_1 = arith.constant 0 : i32
    return %c0_i32, %c0_i32_0 : i32, i32
  }
  func.func @transform_3(%arg0: i32) -> (i32, i32) {
    %c0_i32 = arith.constant 0 : i32
    %c0_i32_0 = arith.constant 0 : i32
    %c0_i32_1 = arith.constant 0 : i32
    return %c0_i32, %c0_i32_0 : i32, i32
  }
  func.func @transform_4(%arg0: i32) -> (i32, i32, i32) {
    %c0_i32 = arith.constant 0 : i32
    %c0_i32_0 = arith.constant 0 : i32
    %c0_i32_1 = arith.constant 0 : i32
    %c0_i32_2 = arith.constant 0 : i32
    return %c0_i32, %c0_i32_0, %c0_i32_1 : i32, i32, i32
  }
}

module attributes {stable_mosaic.version = 11 : i64} {
  func.func @kernel(%arg0: i32, %arg1: memref<2x10x160xbf16, #tpu.memory_space<vmem>>, %arg2: memref<480x128xbf16, #tpu.memory_space<vmem>>, %arg3: memref<3x128xf32, #tpu.memory_space<vmem>>, %arg4: memref<128x128xf32, #tpu.memory_space<vmem>>, %arg5: memref<2x8x128xbf16, #tpu.memory_space<vmem>>, %arg6: memref<2x8x128xbf16, #tpu.memory_space<vmem>>) attributes {dimension_semantics = [#tpu.dimension_semantics<arbitrary>], iteration_bounds = array<i64: 1>, scalar_prefetch = 0 : i64, scratch_operands = 0 : i64, tpu.core_type = #tpu.core_type<tc>, window_params = [{pipeline_mode = #tpu.pipeline_mode<synchronous>, transform_indices = @transform_0, window_bounds = array<i64: 2, 10, 160>}, {pipeline_mode = #tpu.pipeline_mode<synchronous>, transform_indices = @transform_1, window_bounds = array<i64: 480, 128>}, {pipeline_mode = #tpu.pipeline_mode<synchronous>, transform_indices = @transform_2, window_bounds = array<i64: 3, 128>}, {pipeline_mode = #tpu.pipeline_mode<synchronous>, transform_indices = @transform_3, window_bounds = array<i64: 128, 128>}, {pipeline_mode = #tpu.pipeline_mode<synchronous>, transform_indices = @transform_4, window_bounds = array<i64: 2, 8, 128>}, {pipeline_mode = #tpu.pipeline_mode<synchronous>, transform_indices = @transform_5, window_bounds = array<i64: 2, 8, 128>}]} {
    %c0 = arith.constant 0 : index
    %c0_0 = arith.constant 0 : index
    %c0_1 = arith.constant 0 : index
    %0 = vector.load %arg1[%c0, %c0_0, %c0_1] : memref<2x10x160xbf16, #tpu.memory_space<vmem>>, vector<2x10x160xbf16>
    %1 = vector.extract_strided_slice %0 {offsets = [0, 0, 0], sizes = [2, 8, 160], strides = [1, 1, 1]} : vector<2x10x160xbf16> to vector<2x8x160xbf16>
    %2 = vector.shape_cast %1 : vector<2x8x160xbf16> to vector<16x160xbf16>
    %3 = vector.extract_strided_slice %0 {offsets = [0, 1, 0], sizes = [2, 8, 160], strides = [1, 1, 1]} : vector<2x10x160xbf16> to vector<2x8x160xbf16>
    %4 = vector.shape_cast %3 : vector<2x8x160xbf16> to vector<16x160xbf16>
    %5 = vector.extract_strided_slice %0 {offsets = [0, 2, 0], sizes = [2, 8, 160], strides = [1, 1, 1]} : vector<2x10x160xbf16> to vector<2x8x160xbf16>
    %6 = vector.shape_cast %5 : vector<2x8x160xbf16> to vector<16x160xbf16>
    %7 = tpu.concatenate %2, %4, %6 in 1 : vector<16x160xbf16>, vector<16x160xbf16>, vector<16x160xbf16> -> vector<16x480xbf16>
    %c0_2 = arith.constant 0 : index
    %c0_3 = arith.constant 0 : index
    %8 = vector.load %arg2[%c0_2, %c0_3] : memref<480x128xbf16, #tpu.memory_space<vmem>>, vector<480x128xbf16>
    %cst = arith.constant dense<0.000000e+00> : vector<16x128xf32>
    %9 = tpu.matmul %7, %8, %cst {dimension_numbers = #tpu.dot_dimension_numbers<[1], [0], [0], [1], [0, 0, 1, 1], [], []>} : vector<16x480xbf16>, vector<480x128xbf16>, vector<16x128xf32> -> vector<16x128xf32>
    %c0_4 = arith.constant 0 : index
    %c0_5 = arith.constant 0 : index
    %10 = vector.load %arg3[%c0_4, %c0_5] : memref<3x128xf32, #tpu.memory_space<vmem>>, vector<1x128xf32>
    %11 = vector.broadcast %10 : vector<1x128xf32> to vector<16x128xf32>
    %12 = arith.addf %9, %11 : vector<16x128xf32>
    %cst_6 = arith.constant dense<0.000000e+00> : vector<128xf32>
    %13 = vector.multi_reduction <add>, %12, %cst_6 [0] : vector<16x128xf32> to vector<128xf32>
    %14 = vector.shape_cast %13 : vector<128xf32> to vector<1x128xf32>
    %c0_7 = arith.constant 0 : index
    %c0_8 = arith.constant 0 : index
    %15 = vector.load %arg4[%c0_7, %c0_8] : memref<128x128xf32, #tpu.memory_space<vmem>>, vector<128x128xf32>
    %cst_9 = arith.constant dense<0.000000e+00> : vector<1x128xf32>
    %16 = tpu.matmul %14, %15, %cst_9 {dimension_numbers = #tpu.dot_dimension_numbers<[1], [0], [0], [1], [0, 0, 1, 1], [], []>} : vector<1x128xf32>, vector<128x128xf32>, vector<1x128xf32> -> vector<1x128xf32>
    %17 = arith.mulf %12, %12 : vector<16x128xf32>
    %cst_10 = arith.constant dense<0.000000e+00> : vector<128xf32>
    %18 = vector.multi_reduction <add>, %17, %cst_10 [0] : vector<16x128xf32> to vector<128xf32>
    %19 = vector.shape_cast %18 : vector<128xf32> to vector<1x128xf32>
    %c0_11 = arith.constant 0 : index
    %c0_12 = arith.constant 0 : index
    %20 = vector.load %arg4[%c0_11, %c0_12] : memref<128x128xf32, #tpu.memory_space<vmem>>, vector<128x128xf32>
    %cst_13 = arith.constant dense<0.000000e+00> : vector<1x128xf32>
    %21 = tpu.matmul %19, %20, %cst_13 {dimension_numbers = #tpu.dot_dimension_numbers<[1], [0], [0], [1], [0, 0, 1, 1], [], []>} : vector<1x128xf32>, vector<128x128xf32>, vector<1x128xf32> -> vector<1x128xf32>
    %cst_14 = arith.constant 7.812500e-03 : f32
    %22 = vector.broadcast %cst_14 : f32 to vector<1x128xf32>
    %23 = arith.mulf %16, %22 : vector<1x128xf32>
    %cst_15 = arith.constant 7.812500e-03 : f32
    %24 = vector.broadcast %cst_15 : f32 to vector<1x128xf32>
    %25 = arith.mulf %21, %24 : vector<1x128xf32>
    %26 = arith.mulf %23, %23 : vector<1x128xf32>
    %27 = arith.subf %25, %26 : vector<1x128xf32>
    %cst_16 = arith.constant 0.000000e+00 : f32
    %28 = vector.broadcast %cst_16 : f32 to vector<1x128xf32>
    %29 = arith.maximumf %27, %28 : vector<1x128xf32>
    %c1 = arith.constant 1 : index
    %c0_17 = arith.constant 0 : index
    %30 = vector.load %arg3[%c1, %c0_17] : memref<3x128xf32, #tpu.memory_space<vmem>>, vector<1x128xf32>
    %cst_18 = arith.constant 9.99999974E-6 : f32
    %31 = vector.broadcast %cst_18 : f32 to vector<1x128xf32>
    %32 = arith.addf %29, %31 : vector<1x128xf32>
    %33 = math.rsqrt %32 : vector<1x128xf32>
    %34 = arith.mulf %30, %33 : vector<1x128xf32>
    %c2 = arith.constant 2 : index
    %c0_19 = arith.constant 0 : index
    %35 = vector.load %arg3[%c2, %c0_19] : memref<3x128xf32, #tpu.memory_space<vmem>>, vector<1x128xf32>
    %36 = arith.mulf %23, %34 : vector<1x128xf32>
    %37 = arith.subf %35, %36 : vector<1x128xf32>
    %38 = vector.broadcast %34 : vector<1x128xf32> to vector<16x128xf32>
    %39 = arith.mulf %12, %38 : vector<16x128xf32>
    %40 = vector.broadcast %37 : vector<1x128xf32> to vector<16x128xf32>
    %41 = arith.addf %39, %40 : vector<16x128xf32>
    %cst_20 = arith.constant 0.000000e+00 : f32
    %42 = vector.broadcast %cst_20 : f32 to vector<16x128xf32>
    %43 = arith.maximumf %41, %42 : vector<16x128xf32>
    %44 = vector.shape_cast %43 : vector<16x128xf32> to vector<2x8x128xf32>
    %c0_21 = arith.constant 0 : index
    %c0_22 = arith.constant 0 : index
    %c0_23 = arith.constant 0 : index
    %45 = vector.load %arg5[%c0_21, %c0_22, %c0_23] : memref<2x8x128xbf16, #tpu.memory_space<vmem>>, vector<2x8x128xbf16>
    %46 = arith.extf %45 : vector<2x8x128xbf16> to vector<2x8x128xf32>
    %47 = arith.addf %44, %46 : vector<2x8x128xf32>
    %48 = arith.truncf %47 : vector<2x8x128xf32> to vector<2x8x128xbf16>
    %c0_24 = arith.constant 0 : index
    %c0_25 = arith.constant 0 : index
    %c0_26 = arith.constant 0 : index
    %49 = vector.load %arg6[%c0_24, %c0_25, %c0_26] : memref<2x8x128xbf16, #tpu.memory_space<vmem>>, vector<2x8x128xbf16>
    tpu.vector_store %arg6[%c0_24, %c0_25, %c0_26], %48 {strides = array<i32>} : memref<2x8x128xbf16, #tpu.memory_space<vmem>>, vector<2x8x128xbf16>,
    return
  }
  func.func @transform_0(%arg0: i32) -> (i32, i32, i32) {
    %c0_i32 = arith.constant 0 : i32
    %c0_i32_0 = arith.constant 0 : i32
    %c0_i32_1 = arith.constant 0 : i32
    %c0_i32_2 = arith.constant 0 : i32
    return %c0_i32, %c0_i32_0, %c0_i32_1 : i32, i32, i32
  }
  func.func @transform_1(%arg0: i32) -> (i32, i32) {
    %c0_i32 = arith.constant 0 : i32
    %c0_i32_0 = arith.constant 0 : i32
    %c0_i32_1 = arith.constant 0 : i32
    return %c0_i32, %c0_i32_0 : i32, i32
  }
  func.func @transform_2(%arg0: i32) -> (i32, i32) {
    %c0_i32 = arith.constant 0 : i32
    %c0_i32_0 = arith.constant 0 : i32
    %c0_i32_1 = arith.constant 0 : i32
    return %c0_i32, %c0_i32_0 : i32, i32
  }
  func.func @transform_3(%arg0: i32) -> (i32, i32) {
    %c0_i32 = arith.constant 0 : i32
    %c0_i32_0 = arith.constant 0 : i32
    %c0_i32_1 = arith.constant 0 : i32
    return %c0_i32, %c0_i32_0 : i32, i32
  }
  func.func @transform_4(%arg0: i32) -> (i32, i32, i32) {
    %c0_i32 = arith.constant 0 : i32
    %c0_i32_0 = arith.constant 0 : i32
    %c0_i32_1 = arith.constant 0 : i32
    %c0_i32_2 = arith.constant 0 : i32
    return %c0_i32, %c0_i32_0, %c0_i32_1 : i32, i32, i32
  }
  func.func @transform_5(%arg0: i32) -> (i32, i32, i32) {
    %c0_i32 = arith.constant 0 : i32
    %c0_i32_0 = arith.constant 0 : i32
    %c0_i32_1 = arith.constant 0 : i32
    %c0_i32_2 = arith.constant 0 : i32
    return %c0_i32, %c0_i32_0, %c0_i32_1 : i32, i32, i32
  }
}

module attributes {stable_mosaic.version = 11 : i64} {
  func.func @kernel(%arg0: i32, %arg1: memref<2x8x32xbf16, #tpu.memory_space<vmem>>, %arg2: memref<32x128xbf16, #tpu.memory_space<vmem>>, %arg3: memref<3x128xf32, #tpu.memory_space<vmem>>, %arg4: memref<128x128xf32, #tpu.memory_space<vmem>>, %arg5: memref<2x8x128xbf16, #tpu.memory_space<vmem>>) attributes {dimension_semantics = [#tpu.dimension_semantics<arbitrary>], iteration_bounds = array<i64: 1>, scalar_prefetch = 0 : i64, scratch_operands = 0 : i64, tpu.core_type = #tpu.core_type<tc>, window_params = [{pipeline_mode = #tpu.pipeline_mode<synchronous>, transform_indices = @transform_0, window_bounds = array<i64: 2, 8, 32>}, {pipeline_mode = #tpu.pipeline_mode<synchronous>, transform_indices = @transform_1, window_bounds = array<i64: 32, 128>}, {pipeline_mode = #tpu.pipeline_mode<synchronous>, transform_indices = @transform_2, window_bounds = array<i64: 3, 128>}, {pipeline_mode = #tpu.pipeline_mode<synchronous>, transform_indices = @transform_3, window_bounds = array<i64: 128, 128>}, {pipeline_mode = #tpu.pipeline_mode<synchronous>, transform_indices = @transform_4, window_bounds = array<i64: 2, 8, 128>}]} {
    %c0 = arith.constant 0 : index
    %c0_0 = arith.constant 0 : index
    %c0_1 = arith.constant 0 : index
    %0 = vector.load %arg1[%c0, %c0_0, %c0_1] : memref<2x8x32xbf16, #tpu.memory_space<vmem>>, vector<2x8x32xbf16>
    %1 = vector.shape_cast %0 : vector<2x8x32xbf16> to vector<16x32xbf16>
    %c0_2 = arith.constant 0 : index
    %c0_3 = arith.constant 0 : index
    %2 = vector.load %arg2[%c0_2, %c0_3] : memref<32x128xbf16, #tpu.memory_space<vmem>>, vector<32x128xbf16>
    %cst = arith.constant dense<0.000000e+00> : vector<16x128xf32>
    %3 = tpu.matmul %1, %2, %cst {dimension_numbers = #tpu.dot_dimension_numbers<[1], [0], [0], [1], [0, 0, 1, 1], [], []>} : vector<16x32xbf16>, vector<32x128xbf16>, vector<16x128xf32> -> vector<16x128xf32>
    %c0_4 = arith.constant 0 : index
    %c0_5 = arith.constant 0 : index
    %4 = vector.load %arg3[%c0_4, %c0_5] : memref<3x128xf32, #tpu.memory_space<vmem>>, vector<1x128xf32>
    %5 = vector.broadcast %4 : vector<1x128xf32> to vector<16x128xf32>
    %6 = arith.addf %3, %5 : vector<16x128xf32>
    %cst_6 = arith.constant dense<0.000000e+00> : vector<128xf32>
    %7 = vector.multi_reduction <add>, %6, %cst_6 [0] : vector<16x128xf32> to vector<128xf32>
    %8 = vector.shape_cast %7 : vector<128xf32> to vector<1x128xf32>
    %c0_7 = arith.constant 0 : index
    %c0_8 = arith.constant 0 : index
    %9 = vector.load %arg4[%c0_7, %c0_8] : memref<128x128xf32, #tpu.memory_space<vmem>>, vector<128x128xf32>
    %cst_9 = arith.constant dense<0.000000e+00> : vector<1x128xf32>
    %10 = tpu.matmul %8, %9, %cst_9 {dimension_numbers = #tpu.dot_dimension_numbers<[1], [0], [0], [1], [0, 0, 1, 1], [], []>} : vector<1x128xf32>, vector<128x128xf32>, vector<1x128xf32> -> vector<1x128xf32>
    %11 = arith.mulf %6, %6 : vector<16x128xf32>
    %cst_10 = arith.constant dense<0.000000e+00> : vector<128xf32>
    %12 = vector.multi_reduction <add>, %11, %cst_10 [0] : vector<16x128xf32> to vector<128xf32>
    %13 = vector.shape_cast %12 : vector<128xf32> to vector<1x128xf32>
    %c0_11 = arith.constant 0 : index
    %c0_12 = arith.constant 0 : index
    %14 = vector.load %arg4[%c0_11, %c0_12] : memref<128x128xf32, #tpu.memory_space<vmem>>, vector<128x128xf32>
    %cst_13 = arith.constant dense<0.000000e+00> : vector<1x128xf32>
    %15 = tpu.matmul %13, %14, %cst_13 {dimension_numbers = #tpu.dot_dimension_numbers<[1], [0], [0], [1], [0, 0, 1, 1], [], []>} : vector<1x128xf32>, vector<128x128xf32>, vector<1x128xf32> -> vector<1x128xf32>
    %cst_14 = arith.constant 7.812500e-03 : f32
    %16 = vector.broadcast %cst_14 : f32 to vector<1x128xf32>
    %17 = arith.mulf %10, %16 : vector<1x128xf32>
    %cst_15 = arith.constant 7.812500e-03 : f32
    %18 = vector.broadcast %cst_15 : f32 to vector<1x128xf32>
    %19 = arith.mulf %15, %18 : vector<1x128xf32>
    %20 = arith.mulf %17, %17 : vector<1x128xf32>
    %21 = arith.subf %19, %20 : vector<1x128xf32>
    %cst_16 = arith.constant 0.000000e+00 : f32
    %22 = vector.broadcast %cst_16 : f32 to vector<1x128xf32>
    %23 = arith.maximumf %21, %22 : vector<1x128xf32>
    %c1 = arith.constant 1 : index
    %c0_17 = arith.constant 0 : index
    %24 = vector.load %arg3[%c1, %c0_17] : memref<3x128xf32, #tpu.memory_space<vmem>>, vector<1x128xf32>
    %cst_18 = arith.constant 9.99999974E-6 : f32
    %25 = vector.broadcast %cst_18 : f32 to vector<1x128xf32>
    %26 = arith.addf %23, %25 : vector<1x128xf32>
    %27 = math.rsqrt %26 : vector<1x128xf32>
    %28 = arith.mulf %24, %27 : vector<1x128xf32>
    %c2 = arith.constant 2 : index
    %c0_19 = arith.constant 0 : index
    %29 = vector.load %arg3[%c2, %c0_19] : memref<3x128xf32, #tpu.memory_space<vmem>>, vector<1x128xf32>
    %30 = arith.mulf %17, %28 : vector<1x128xf32>
    %31 = arith.subf %29, %30 : vector<1x128xf32>
    %32 = vector.broadcast %28 : vector<1x128xf32> to vector<16x128xf32>
    %33 = arith.mulf %6, %32 : vector<16x128xf32>
    %34 = vector.broadcast %31 : vector<1x128xf32> to vector<16x128xf32>
    %35 = arith.addf %33, %34 : vector<16x128xf32>
    %cst_20 = arith.constant 0.000000e+00 : f32
    %36 = vector.broadcast %cst_20 : f32 to vector<16x128xf32>
    %37 = arith.maximumf %35, %36 : vector<16x128xf32>
    %38 = vector.shape_cast %37 : vector<16x128xf32> to vector<2x8x128xf32>
    %39 = arith.truncf %38 : vector<2x8x128xf32> to vector<2x8x128xbf16>
    %c0_21 = arith.constant 0 : index
    %c0_22 = arith.constant 0 : index
    %c0_23 = arith.constant 0 : index
    %40 = vector.load %arg5[%c0_21, %c0_22, %c0_23] : memref<2x8x128xbf16, #tpu.memory_space<vmem>>, vector<2x8x128xbf16>
    tpu.vector_store %arg5[%c0_21, %c0_22, %c0_23], %39 {strides = array<i32>} : memref<2x8x128xbf16, #tpu.memory_space<vmem>>, vector<2x8x128xbf16>,
    return
  }
  func.func @transform_0(%arg0: i32) -> (i32, i32, i32) {
    %c0_i32 = arith.constant 0 : i32
    %c0_i32_0 = arith.constant 0 : i32
    %c0_i32_1 = arith.constant 0 : i32
    %c0_i32_2 = arith.constant 0 : i32
    return %c0_i32, %c0_i32_0, %c0_i32_1 : i32, i32, i32
  }
  func.func @transform_1(%arg0: i32) -> (i32, i32) {
    %c0_i32 = arith.constant 0 : i32
    %c0_i32_0 = arith.constant 0 : i32
    %c0_i32_1 = arith.constant 0 : i32
    return %c0_i32, %c0_i32_0 : i32, i32
  }
  func.func @transform_2(%arg0: i32) -> (i32, i32) {
    %c0_i32 = arith.constant 0 : i32
    %c0_i32_0 = arith.constant 0 : i32
    %c0_i32_1 = arith.constant 0 : i32
    return %c0_i32, %c0_i32_0 : i32, i32
  }
  func.func @transform_3(%arg0: i32) -> (i32, i32) {
    %c0_i32 = arith.constant 0 : i32
    %c0_i32_0 = arith.constant 0 : i32
    %c0_i32_1 = arith.constant 0 : i32
    return %c0_i32, %c0_i32_0 : i32, i32
  }
  func.func @transform_4(%arg0: i32) -> (i32, i32, i32) {
    %c0_i32 = arith.constant 0 : i32
    %c0_i32_0 = arith.constant 0 : i32
    %c0_i32_1 = arith.constant 0 : i32
    %c0_i32_2 = arith.constant 0 : i32
    return %c0_i32, %c0_i32_0, %c0_i32_1 : i32, i32, i32
  }
}

module attributes {stable_mosaic.version = 11 : i64} {
  func.func @kernel(%arg0: i32, %arg1: memref<2x10x160xbf16, #tpu.memory_space<vmem>>, %arg2: memref<480x128xbf16, #tpu.memory_space<vmem>>, %arg3: memref<3x128xf32, #tpu.memory_space<vmem>>, %arg4: memref<128x128xf32, #tpu.memory_space<vmem>>, %arg5: memref<2x8x128xbf16, #tpu.memory_space<vmem>>) attributes {dimension_semantics = [#tpu.dimension_semantics<arbitrary>], iteration_bounds = array<i64: 1>, scalar_prefetch = 0 : i64, scratch_operands = 0 : i64, tpu.core_type = #tpu.core_type<tc>, window_params = [{pipeline_mode = #tpu.pipeline_mode<synchronous>, transform_indices = @transform_0, window_bounds = array<i64: 2, 10, 160>}, {pipeline_mode = #tpu.pipeline_mode<synchronous>, transform_indices = @transform_1, window_bounds = array<i64: 480, 128>}, {pipeline_mode = #tpu.pipeline_mode<synchronous>, transform_indices = @transform_2, window_bounds = array<i64: 3, 128>}, {pipeline_mode = #tpu.pipeline_mode<synchronous>, transform_indices = @transform_3, window_bounds = array<i64: 128, 128>}, {pipeline_mode = #tpu.pipeline_mode<synchronous>, transform_indices = @transform_4, window_bounds = array<i64: 2, 8, 128>}]} {
    %c0 = arith.constant 0 : index
    %c0_0 = arith.constant 0 : index
    %c0_1 = arith.constant 0 : index
    %0 = vector.load %arg1[%c0, %c0_0, %c0_1] : memref<2x10x160xbf16, #tpu.memory_space<vmem>>, vector<2x10x160xbf16>
    %1 = vector.extract_strided_slice %0 {offsets = [0, 0, 0], sizes = [2, 8, 160], strides = [1, 1, 1]} : vector<2x10x160xbf16> to vector<2x8x160xbf16>
    %2 = vector.shape_cast %1 : vector<2x8x160xbf16> to vector<16x160xbf16>
    %3 = vector.extract_strided_slice %0 {offsets = [0, 1, 0], sizes = [2, 8, 160], strides = [1, 1, 1]} : vector<2x10x160xbf16> to vector<2x8x160xbf16>
    %4 = vector.shape_cast %3 : vector<2x8x160xbf16> to vector<16x160xbf16>
    %5 = vector.extract_strided_slice %0 {offsets = [0, 2, 0], sizes = [2, 8, 160], strides = [1, 1, 1]} : vector<2x10x160xbf16> to vector<2x8x160xbf16>
    %6 = vector.shape_cast %5 : vector<2x8x160xbf16> to vector<16x160xbf16>
    %7 = tpu.concatenate %2, %4, %6 in 1 : vector<16x160xbf16>, vector<16x160xbf16>, vector<16x160xbf16> -> vector<16x480xbf16>
    %c0_2 = arith.constant 0 : index
    %c0_3 = arith.constant 0 : index
    %8 = vector.load %arg2[%c0_2, %c0_3] : memref<480x128xbf16, #tpu.memory_space<vmem>>, vector<480x128xbf16>
    %cst = arith.constant dense<0.000000e+00> : vector<16x128xf32>
    %9 = tpu.matmul %7, %8, %cst {dimension_numbers = #tpu.dot_dimension_numbers<[1], [0], [0], [1], [0, 0, 1, 1], [], []>} : vector<16x480xbf16>, vector<480x128xbf16>, vector<16x128xf32> -> vector<16x128xf32>
    %c0_4 = arith.constant 0 : index
    %c0_5 = arith.constant 0 : index
    %10 = vector.load %arg3[%c0_4, %c0_5] : memref<3x128xf32, #tpu.memory_space<vmem>>, vector<1x128xf32>
    %11 = vector.broadcast %10 : vector<1x128xf32> to vector<16x128xf32>
    %12 = arith.addf %9, %11 : vector<16x128xf32>
    %cst_6 = arith.constant dense<0.000000e+00> : vector<128xf32>
    %13 = vector.multi_reduction <add>, %12, %cst_6 [0] : vector<16x128xf32> to vector<128xf32>
    %14 = vector.shape_cast %13 : vector<128xf32> to vector<1x128xf32>
    %c0_7 = arith.constant 0 : index
    %c0_8 = arith.constant 0 : index
    %15 = vector.load %arg4[%c0_7, %c0_8] : memref<128x128xf32, #tpu.memory_space<vmem>>, vector<128x128xf32>
    %cst_9 = arith.constant dense<0.000000e+00> : vector<1x128xf32>
    %16 = tpu.matmul %14, %15, %cst_9 {dimension_numbers = #tpu.dot_dimension_numbers<[1], [0], [0], [1], [0, 0, 1, 1], [], []>} : vector<1x128xf32>, vector<128x128xf32>, vector<1x128xf32> -> vector<1x128xf32>
    %17 = arith.mulf %12, %12 : vector<16x128xf32>
    %cst_10 = arith.constant dense<0.000000e+00> : vector<128xf32>
    %18 = vector.multi_reduction <add>, %17, %cst_10 [0] : vector<16x128xf32> to vector<128xf32>
    %19 = vector.shape_cast %18 : vector<128xf32> to vector<1x128xf32>
    %c0_11 = arith.constant 0 : index
    %c0_12 = arith.constant 0 : index
    %20 = vector.load %arg4[%c0_11, %c0_12] : memref<128x128xf32, #tpu.memory_space<vmem>>, vector<128x128xf32>
    %cst_13 = arith.constant dense<0.000000e+00> : vector<1x128xf32>
    %21 = tpu.matmul %19, %20, %cst_13 {dimension_numbers = #tpu.dot_dimension_numbers<[1], [0], [0], [1], [0, 0, 1, 1], [], []>} : vector<1x128xf32>, vector<128x128xf32>, vector<1x128xf32> -> vector<1x128xf32>
    %cst_14 = arith.constant 7.812500e-03 : f32
    %22 = vector.broadcast %cst_14 : f32 to vector<1x128xf32>
    %23 = arith.mulf %16, %22 : vector<1x128xf32>
    %cst_15 = arith.constant 7.812500e-03 : f32
    %24 = vector.broadcast %cst_15 : f32 to vector<1x128xf32>
    %25 = arith.mulf %21, %24 : vector<1x128xf32>
    %26 = arith.mulf %23, %23 : vector<1x128xf32>
    %27 = arith.subf %25, %26 : vector<1x128xf32>
    %cst_16 = arith.constant 0.000000e+00 : f32
    %28 = vector.broadcast %cst_16 : f32 to vector<1x128xf32>
    %29 = arith.maximumf %27, %28 : vector<1x128xf32>
    %c1 = arith.constant 1 : index
    %c0_17 = arith.constant 0 : index
    %30 = vector.load %arg3[%c1, %c0_17] : memref<3x128xf32, #tpu.memory_space<vmem>>, vector<1x128xf32>
    %cst_18 = arith.constant 9.99999974E-6 : f32
    %31 = vector.broadcast %cst_18 : f32 to vector<1x128xf32>
    %32 = arith.addf %29, %31 : vector<1x128xf32>
    %33 = math.rsqrt %32 : vector<1x128xf32>
    %34 = arith.mulf %30, %33 : vector<1x128xf32>
    %c2 = arith.constant 2 : index
    %c0_19 = arith.constant 0 : index
    %35 = vector.load %arg3[%c2, %c0_19] : memref<3x128xf32, #tpu.memory_space<vmem>>, vector<1x128xf32>
    %36 = arith.mulf %23, %34 : vector<1x128xf32>
    %37 = arith.subf %35, %36 : vector<1x128xf32>
    %38 = vector.broadcast %34 : vector<1x128xf32> to vector<16x128xf32>
    %39 = arith.mulf %12, %38 : vector<16x128xf32>
    %40 = vector.broadcast %37 : vector<1x128xf32> to vector<16x128xf32>
    %41 = arith.addf %39, %40 : vector<16x128xf32>
    %cst_20 = arith.constant 0.000000e+00 : f32
    %42 = vector.broadcast %cst_20 : f32 to vector<16x128xf32>
    %43 = arith.maximumf %41, %42 : vector<16x128xf32>
    %44 = vector.shape_cast %43 : vector<16x128xf32> to vector<2x8x128xf32>
    %45 = arith.truncf %44 : vector<2x8x128xf32> to vector<2x8x128xbf16>
    %c0_21 = arith.constant 0 : index
    %c0_22 = arith.constant 0 : index
    %c0_23 = arith.constant 0 : index
    %46 = vector.load %arg5[%c0_21, %c0_22, %c0_23] : memref<2x8x128xbf16, #tpu.memory_space<vmem>>, vector<2x8x128xbf16>
    tpu.vector_store %arg5[%c0_21, %c0_22, %c0_23], %45 {strides = array<i32>} : memref<2x8x128xbf16, #tpu.memory_space<vmem>>, vector<2x8x128xbf16>,
    return
  }
  func.func @transform_0(%arg0: i32) -> (i32, i32, i32) {
    %c0_i32 = arith.constant 0 : i32
    %c0_i32_0 = arith.constant 0 : i32
    %c0_i32_1 = arith.constant 0 : i32
    %c0_i32_2 = arith.constant 0 : i32
    return %c0_i32, %c0_i32_0, %c0_i32_1 : i32, i32, i32
  }
  func.func @transform_1(%arg0: i32) -> (i32, i32) {
    %c0_i32 = arith.constant 0 : i32
    %c0_i32_0 = arith.constant 0 : i32
    %c0_i32_1 = arith.constant 0 : i32
    return %c0_i32, %c0_i32_0 : i32, i32
  }
  func.func @transform_2(%arg0: i32) -> (i32, i32) {
    %c0_i32 = arith.constant 0 : i32
    %c0_i32_0 = arith.constant 0 : i32
    %c0_i32_1 = arith.constant 0 : i32
    return %c0_i32, %c0_i32_0 : i32, i32
  }
  func.func @transform_3(%arg0: i32) -> (i32, i32) {
    %c0_i32 = arith.constant 0 : i32
    %c0_i32_0 = arith.constant 0 : i32
    %c0_i32_1 = arith.constant 0 : i32
    return %c0_i32, %c0_i32_0 : i32, i32
  }
  func.func @transform_4(%arg0: i32) -> (i32, i32, i32) {
    %c0_i32 = arith.constant 0 : i32
    %c0_i32_0 = arith.constant 0 : i32
    %c0_i32_1 = arith.constant 0 : i32
    %c0_i32_2 = arith.constant 0 : i32
    return %c0_i32, %c0_i32_0, %c0_i32_1 : i32, i32, i32
  }
}

</mosaic_0001>

<bundles_post_ra>
// kernel: tile.93
= control target key start
LH: loop header
LB: loop body
LE: loop exit
PB: predicated region body
PF: predicated region fallthrough
CT: control target
= control target key end

     0   :  { %s22_s0 = inlined_call_operand.vmem [shape: f32[16], index: 0, kind: input, shape index: {}]   ;;  %s23_s1 = inlined_call_operand.vmem [shape: f32[8,16], index: 1, kind: output, shape index: {}]  }
   0x1   :  { %v4_v0 = vld [vmem:[%s22_s0] ss:$0 sm:$0xff] }
   0x2   :  { %5 = vst [vmem:[%s23_s1] sm:$0xff] %v4_v0 }

// kernel: tile.102
= control target key start
LH: loop header
LB: loop body
LE: loop exit
PB: predicated region body
PF: predicated region fallthrough
CT: control target
= control target key end

     0   :  { %s67_s10 = smov 112   ;;  %s68_s11 = smov 80   ;;  %vm3_vm0 = vcmask 130048   ;;  %vm9_vm1 = vcmask 1048448   ;;  %vm15_vm2 = vcmask 917248   ;;  %vm21_vm3 = vcmask 786048   ;;  %s111_s0 = inlined_call_operand.vmem [shape: f32[8,16], index: 0, kind: input, shape index: {}]   ;;  %s112_s1 = inlined_call_operand.vmem [shape: f32[1,128], index: 1, kind: output, shape index: {}]  }
   0x1   :  { %v53_v0 = vld [vmem:[%s111_s0 + $0x7] sm:$0x1]   ;;  %v55_v1 = vld [vmem:[%s111_s0 + $0x5] sm:$0x1]   ;;  %v57_v2 = vld [vmem:[%s111_s0 + $0x3] sm:$0x1]  }
   0x2   :  { %7 = vrot.lane.b32.xlu0 %v53_v0, %s67_s10  ;;  %19 = vrot.lane.b32.xlu1 %v55_v1, %s68_s11  ;;  %s69_s14 = smov 48   ;;  %v54_v3 = vld [vmem:[%s111_s0 + $0x6] sm:$0x1]   ;;  %v56_v4 = vld [vmem:[%s111_s0 + $0x4] sm:$0x1]   ;;  %s70_s21 = smov 96  }
   0x3   :  { %31 = vrot.lane.b32.xlu2 %v57_v2, %s69_s14  ;;  %v58_v5 = vld [vmem:[%s111_s0 + $0x2] sm:$0x1]   ;;  %s71_s22 = smov 64   ;;  %s72_s23 = smov 32   ;;  %v59_v6 = vld [vmem:[%s111_s0 + $0x1] sm:$0x1]  }
   0x4   :  { %s73_s26 = smov 16   ;;  %v2_v7 = vld [vmem:[%s111_s0] sm:$0x1]   ;;  %vm27_vm4 = vcmask 654848   ;;  %vm33_vm5 = vcmask 523648   ;;  %vm39_vm6 = vcmask 392448  }
   0x5   :  { %4 = vst.msk [vmem:[#allocation0] sm:$0x1] %vm3_vm0, %v2_v7   ;;  %vm45_vm7 = vcmask 261248  }
   0xa   :  { %13 = vrot.lane.b32.xlu0 %v54_v3, %s70_s21  ;;  %25 = vrot.lane.b32.xlu1 %v56_v4, %s71_s22 }
   0xb   :  { %37 = vrot.lane.b32.xlu2 %v58_v5, %s72_s23 }
  0x12   :  { %43 = vrot.lane.b32.xlu0 %v59_v6, %s73_s26 }
  0x5d   :  { %v32_v8 = vpop.permute.xlu2 %31  }
  0x65   :  { %v38_v9 = vpop.permute.xlu2 %37  }
  0x74   :  { %v8_v10 = vpop.permute.xlu0 %7   ;;  %v20_v11 = vpop.permute.xlu1 %19  }
  0x75   :  { %10 = vst.msk [vmem:[#allocation0] sm:$0x1] %vm9_vm1, %v8_v10  }
  0x7c   :  { %v14_v12 = vpop.permute.xlu0 %13   ;;  %v26_v13 = vpop.permute.xlu1 %25  }
  0x7d   :  { %16 = vst.msk [vmem:[#allocation0] sm:$0x1] %vm15_vm2, %v14_v12  }
  0x7e   :  { %22 = vst.msk [vmem:[#allocation0] sm:$0x1] %vm21_vm3, %v20_v11  }
  0x7f   :  { %28 = vst.msk [vmem:[#allocation0] sm:$0x1] %vm27_vm4, %v26_v13  }
  0x80   :  { %34 = vst.msk [vmem:[#allocation0] sm:$0x1] %vm33_vm5, %v32_v8  }
  0x81   :  { %40 = vst.msk [vmem:[#allocation0] sm:$0x1] %vm39_vm6, %v38_v9  }
  0x84   :  { %v44_v14 = vpop.permute.xlu0 %43  }
  0x85   :  { %46 = vst.msk [vmem:[#allocation0] sm:$0x1] %vm45_vm7, %v44_v14  }
  0x8c   :  { %v49_v15 = vld [vmem:[#allocation0] sm:$0x1] }
  0x8d   :  { %52 = vst [vmem:[%s112_s1] sm:$0x1] %v49_v15 }

// kernel: encoder_forward.6
= control target key start
LH: loop header
LB: loop body
LE: loop exit
PB: predicated region body
PF: predicated region fallthrough
CT: control target
= control target key end

     0   :  { %vm21_vm0 = vsmask.f32 3328  ;;  %vm22_vm1 = vsmask.f32 7440  ;;  %vm56_vm2 = vcmask 1042432   ;;  %vm57_vm4 = vcmask 1046532   ;;  %s470_s0 = inlined_call_operand.vmem [shape: bf16[2,10,40], index: 0, kind: input, shape index: {}]   ;;  %s471_s1 = inlined_call_operand.vmem [shape: bf16[120,128], index: 1, kind: input, shape index: {}]   ;;  %s472_s2 = inlined_call_operand.vmem [shape: f32[3,128], index: 2, kind: input, shape index: {}]   ;;  %s473_s3 = inlined_call_operand.vmem [shape: f32[128,128], index: 3, kind: input, shape index: {}]   ;;  %s474_s4 = inlined_call_operand.vmem [shape: bf16[2,8,128], index: 4, kind: output, shape index: {}]  }
   0x1   :  { %v17_v0 = vld [vmem:[%s470_s0] sm:$0xf]  ;;  %v18_v1 = vld [vmem:[%s470_s0 + $0x4] sm:$0x1]  ;;  %v19_v2 = vld [vmem:[%s470_s0 + $0x8] sm:$0xf] }
   0x2   :  { %v20_v3 = vld [vmem:[%s470_s0 + $0xc] sm:$0x1]  ;;  %v25_v4 = vshrl.u32 %v17_v0, 16  ;;  %v28_v5 = vshll.u32 %v17_v0, 16  ;;  %v34_v6 = vshll.u32 %v18_v1, 16  ;;  %v39_v7 = vshrl.u32 %v19_v2, 16  ;;  %vm374_vm3 = vmor %vm21_vm0, %vm22_vm1 }
   0x3   :  { %v42_v8 = vshll.u32 %v19_v2, 16  ;;  %v48_v9 = vshll.u32 %v20_v3, 16  ;;  %v101_v13 = vld [vmem:[%s471_s1 + $0x38] sm:$0xf]  ;;  %vm152_vm5 = vcmask 1043456   ;;  %v279_v22 = vrot.slane %v17_v0, 9  ;;  %vm58_vm6 = vmor %vm56_vm2, %vm57_vm4 }
   0x4   :  { %v27_v10 = vrot.slane %v25_v4, 4  ;;  %v30_v11 = vrot.slane %v28_v5, 5  ;;  %v41_v12 = vrot.slane %v39_v7, 4  ;;  %v36_v16 = vrot.slane %v34_v6, 5  ;;  %v321_v32 = vld [vmem:[%s471_s1 + $0x30] sm:$0xff]  ;;  %v320_v37 = vld [vmem:[%s471_s1 + $0x28] sm:$0xff] }
   0x5   :  { %v44_v14 = vrot.slane %v42_v8, 5  ;;  %v133_v17 = vunpack.c.l.b16 %v101_v13  ;;  %v50_v20 = vrot.slane %v48_v9, 5  ;;  %v61_v25 = vrot.slane %v18_v1, 5  ;;  %s332_s29 = smov 40   ;;  %v319_v40 = vld [vmem:[%s471_s1 + $0x20] sm:$0xff]  ;;  %v318_v42 = vld [vmem:[%s471_s1 + $0x18] sm:$0xff] }
   0x6   :  { %v31_v15 = vor.u32 %v30_v11, %v27_v10  ;;  %v280_v26 = vrot.slane %v19_v2, 9  ;;  %v65_v27 = vrot.slane %v20_v3, 5  ;;  %s333_s8 = smov 80   ;;  %v317_v43 = vld [vmem:[%s471_s1 + $0x10] sm:$0xff]  ;;  %v316_v44 = vld [vmem:[%s471_s1 + $0x8] sm:$0xff]  ;;  %v315_v45 = vld [vmem:[%s471_s1] sm:$0xff] }
   0x7   :  { %v45_v19 = vor.u32 %v44_v14, %v41_v12  ;;  %v141_v23 = vpack.c.b16 %v133_v17, %v133_v17  ;;  %v62_v34 = vsel %vm58_vm6, %v279_v22, %v61_v25  ;;  %v192_v46 = vld [vmem:[%s473_s3 + $0x78] sm:$0xff]  ;;  %v191_v47 = vld [vmem:[%s473_s3 + $0x70] sm:$0xff]  ;;  %v190_v48 = vld [vmem:[%s473_s3 + $0x68] sm:$0xff]  ;;  %vm80_vm7 = vcmask 326656  }
   0x8   :  { %v32_v21 = vrot.slane %v31_v15, 4  ;;  %v66_v35 = vsel %vm58_vm6, %v280_v26, %v65_v27  ;;  %v75_v38 = vunpack.c.l.b16 %v62_v34  ;;  %193 = vmatpush.msra.mxu1 %v192_v46  ;;  %222 = vmatpush.msra.mxu2 %v192_v46  ;;  %v283_v50 = vld [vmem:[%s470_s0] sm:$0xf]  ;;  %v314_v51 = vld [vmem:[%s470_s0 + $0x4] sm:$0xf0]  ;;  %vm84_vm8 = vcmask 654336  }
   0x9   :  { %v46_v24 = vrot.slane %v45_v19, 4  ;;  %v154_v29 = vsel %vm152_vm5, %v141_v23, 0  ;;  %v76_v39 = vunpack.c.l.b16 %v66_v35  ;;  %v284_v52 = vor.u32 %v314_v51, %v283_v50  ;;  %v189_v56 = vld [vmem:[%s473_s3 + $0x60] sm:$0xff]  ;;  %v188_v57 = vld [vmem:[%s473_s3 + $0x58] sm:$0xff]  ;;  %v187_v58 = vld [vmem:[%s473_s3 + $0x50] sm:$0xff] }
   0xa   :  { %v37_v28 = vsel %vm374_vm3, %v32_v21, %v36_v16  ;;  %156 = vmatpush.bf16.msra.mxu0 %v154_v29  ;;  %194 = vmatpush.msra.mxu1 %v191_v47  ;;  %vm149_vm9 = vcmask 982016   ;;  %v186_v59 = vld [vmem:[%s473_s3 + $0x48] sm:$0xff]  ;;  %v185_v60 = vld [vmem:[%s473_s3 + $0x40] sm:$0xff]  ;;  %v184_v61 = vld [vmem:[%s473_s3 + $0x38] sm:$0xff] }
   0xb   :  { %v51_v30 = vsel %vm374_vm3, %v46_v24, %v50_v20  ;;  %v70_v31 = vunpack.c.l.b16 %v37_v28  ;;  %v77_v41 = vpack.c.b16 %v76_v39, %v75_v38  ;;  %223 = vmatpush.msra.mxu2 %v191_v47  ;;  %v183_v62 = vld [vmem:[%s473_s3 + $0x30] sm:$0xff]  ;;  %v182_v63 = vld [vmem:[%s473_s3 + $0x28] sm:$0xff]  ;;  %v181_v0 = vld [vmem:[%s473_s3 + $0x20] sm:$0xff] }
   0xc   :  { %v71_v33 = vunpack.c.l.b16 %v51_v30  ;;  %195 = vmatpush.msra.mxu1 %v190_v48  ;;  %v180_v1 = vld [vmem:[%s473_s3 + $0x18] sm:$0xff]  ;;  %v179_v2 = vld [vmem:[%s473_s3 + $0x10] sm:$0xff]  ;;  %v178_v3 = vld [vmem:[%s473_s3 + $0x8] sm:$0xff] }
   0xd   :  { %224 = vmatpush.msra.mxu2 %v190_v48  ;;  %v177_v4 = vld [vmem:[%s473_s3] sm:$0xff] }
   0xe   :  { %v72_v36 = vpack.c.b16 %v71_v33, %v70_v31  ;;  %157 = vmatpush.bf16.msra.mxu0 %v321_v32  ;;  %196 = vmatpush.msra.mxu1 %v189_v56  ;;  %v329_v6 = vld [vmem:[%s472_s2] ss:$0 sm:$0xff]  ;;  %v247_v39 = vld [vmem:[%s472_s2 + $0x1] sm:$0x1] }
   0xf   :  { %225 = vmatpush.msra.mxu2 %v189_v56 }
  0x10   :  { %73 = vrot.lane.b32.xlu0 %v72_v36, %s332_s29  ;;  %197 = vmatpush.msra.mxu1 %v188_v57 }
  0x11   :  { %226 = vmatpush.msra.mxu2 %v188_v57 }
  0x12   :  { %158 = vmatpush.bf16.msra.mxu0 %v320_v37  ;;  %198 = vmatpush.msra.mxu1 %v187_v58 }
  0x13   :  { %227 = vmatpush.msra.mxu2 %v187_v58 }
  0x14   :  { %199 = vmatpush.msra.mxu1 %v186_v59 }
  0x15   :  { %228 = vmatpush.msra.mxu2 %v186_v59 }
  0x16   :  { %159 = vmatpush.bf16.msra.mxu0 %v319_v40  ;;  %200 = vmatpush.msra.mxu1 %v185_v60 }
  0x17   :  { %229 = vmatpush.msra.mxu2 %v185_v60 }
  0x18   :  { %78 = vrot.lane.b32.xlu0 %v77_v41, %s333_s8  ;;  %201 = vmatpush.msra.mxu1 %v184_v61 }
  0x19   :  { %230 = vmatpush.msra.mxu2 %v184_v61 }
  0x1a   :  { %160 = vmatpush.bf16.msra.mxu0 %v318_v42  ;;  %202 = vmatpush.msra.mxu1 %v183_v62 }
  0x1b   :  { %231 = vmatpush.msra.mxu2 %v183_v62 }
  0x1c   :  { %203 = vmatpush.msra.mxu1 %v182_v63 }
  0x1d   :  { %232 = vmatpush.msra.mxu2 %v182_v63 }
  0x1e   :  { %161 = vmatpush.bf16.msra.mxu0 %v317_v43  ;;  %204 = vmatpush.msra.mxu1 %v181_v0  ;;  %v260_v43 = vld [vmem:[%s472_s2 + $0x2] sm:$0x1] }
  0x1f   :  { %233 = vmatpush.msra.mxu2 %v181_v0 }
  0x20   :  { %205 = vmatpush.msra.mxu1 %v180_v1 }
  0x21   :  { %234 = vmatpush.msra.mxu2 %v180_v1 }
  0x22   :  { %162 = vmatpush.bf16.msra.mxu0 %v316_v44  ;;  %206 = vmatpush.msra.mxu1 %v179_v2 }
  0x23   :  { %235 = vmatpush.msra.mxu2 %v179_v2 }
  0x24   :  { %207 = vmatpush.msra.mxu1 %v178_v3 }
  0x25   :  { %236 = vmatpush.msra.mxu2 %v178_v3 }
  0x26   :  { %163 = vmatpush.bf16.msra.mxu0 %v315_v45  ;;  %208 = vmatpush.msra.mxu1 %v177_v4 }
  0x27   :  { %237 = vmatpush.msra.mxu2 %v177_v4 }
  0x82   :  { %v74_v49 = vpop.permute.xlu0 %73 }
  0x83   :  { %v83_v53 = vsel %vm80_vm7, %v284_v52, %v74_v49 }
  0x8a   :  { %v79_v54 = vpop.permute.xlu0 %78 }
  0x8b   :  { %v86_v55 = vsel %vm84_vm8, %v83_v53, %v79_v54 }
  0x8c   :  { %313 = vmatmul.msk.bf16.vlgmr.msra.gmra.mxu0 %vm149_vm9, %v86_v55 }
 0x109   :  { %v165_v5 = vpop.f32.mrf.mxu0 }
 0x10a   :  { %v166_v7 = vadd.f32 %v329_v6, %v165_v5 }
 0x10c   :  { %v213_v10 = vmul.f32 %v166_v7, %v166_v7 }
 0x111   :  { %v167_v8 = vpop.f32.mrf.mxu0 }
 0x112   :  { %v168_v9 = vadd.f32 %v329_v6, %v167_v8 }
 0x114   :  { %v170_v11 = vadd.f32 %v168_v9, %v166_v7  ;;  %v214_v12 = vmul.f32 %v168_v9, %v168_v9 }
 0x116   :  { %v171_v13 = vrot.slane %v170_v11, 4  ;;  %v215_v14 = vadd.f32 %v214_v12, %v213_v10 }
 0x118   :  { %v172_v15 = vadd.f32 %v171_v13, %v170_v11  ;;  %v216_v16 = vrot.slane %v215_v14, 4 }
 0x11a   :  { %v173_v17 = vrot.slane %v172_v15, 2  ;;  %v217_v18 = vadd.f32 %v216_v16, %v215_v14 }
 0x11c   :  { %v174_v19 = vadd.f32 %v173_v17, %v172_v15  ;;  %v218_v20 = vrot.slane %v217_v18, 2 }
 0x11e   :  { %v175_v21 = vrot.slane %v174_v19, 1  ;;  %v219_v22 = vadd.f32 %v218_v20, %v217_v18 }
 0x120   :  { %v176_v23 = vadd.f32 %v175_v21, %v174_v19  ;;  %v220_v24 = vrot.slane %v219_v22, 1 }
 0x122   :  { %209 = vmatmul.f32.vlgmr.msra.gmra.mxu1 %v176_v23  ;;  %v221_v25 = vadd.f32 %v220_v24, %v219_v22 }
 0x124   :  { %238 = vmatmul.f32.vlgmr.msra.gmra.mxu2 %v221_v25 }
 0x19f   :  { %v210_v26 = vpop.f32.mrf.mxu1 }
 0x1a0   :  { %v242_v27 = vmul.f32 0.0078125, %v210_v26 }
 0x1a2   :  { %v244_v29 = vmul.f32 %v242_v27, %v242_v27 }
 0x1a7   :  { %v239_v28 = vpop.f32.mrf.mxu2 }
 0x1a8   :  { %v243_v30 = vmul.f32 0.0078125, %v239_v28 }
 0x1aa   :  { %v245_v31 = vsub.f32 %v243_v30, %v244_v29 }
 0x1ac   :  { %v246_v32 = vmax.f32 %v245_v31, 0.0 }
 0x1ae   :  { %v248_v33 = vadd.f32 1e-05, %v246_v32 }
 0x1b0   :  { %330 = vrsqrt.f32 %v248_v33  ;;  %vm255_vm11 = vweird.f32 %v248_v33 }
 0x1b6   :  { %v331_v34 = vpop.eup %330 }
 0x1b7   :  { %v250_v35 = vmul.f32 %v331_v34, %v248_v33  ;;  %vm256_vm10 = vweird.f32 %v331_v34 }
 0x1b8   :  { %vm257_vm12 = vmor %vm255_vm11, %vm256_vm10 }
 0x1b9   :  { %v251_v36 = vmul.f32 %v331_v34, %v250_v35 }
 0x1bb   :  { %v252_v37 = vmul.f32 0.5, %v251_v36 }
 0x1bd   :  { %v253_v38 = vsub.f32 1.5, %v252_v37 }
 0x1bf   :  { %v254_v40 = vmul.f32 %v331_v34, %v253_v38 }
 0x1c1   :  { %v258_v41 = vsel %vm257_vm12, %v331_v34, %v254_v40 }
 0x1c2   :  { %v259_v42 = vmul.f32 %v258_v41, %v247_v39 }
 0x1c4   :  { %v261_v44 = vmul.f32 %v259_v42, %v242_v27  ;;  %v263_v45 = vperm.slane %v259_v42, 0 }
 0x1c6   :  { %v262_v46 = vsub.f32 %v260_v43, %v261_v44  ;;  %v264_v47 = vmul.f32 %v263_v45, %v166_v7  ;;  %v265_v48 = vmul.f32 %v263_v45, %v168_v9 }
 0x1c8   :  { %v266_v49 = vperm.slane %v262_v46, 0 }
 0x1ca   :  { %v267_v50 = vadd.f32 %v266_v49, %v264_v47  ;;  %v268_v51 = vadd.f32 %v266_v49, %v265_v48 }
 0x1cc   :  { %v269_v52 = vmax.f32 %v267_v50, 0.0  ;;  %v270_v53 = vmax.f32 %v268_v51, 0.0 }
 0x1ce   :  { %v325_v54 = vpack.c.bf16 %v270_v53, %v269_v52 }
 0x1d0   :  { %326 = vst [vmem:[%s474_s4] sm:$0xff] %v325_v54  }

// kernel: encoder_forward.5
= control target key start
LH: loop header
LB: loop body
LE: loop exit
PB: predicated region body
PF: predicated region fallthrough
CT: control target
= control target key end

     0   :  { %vm43_vm0 = vcmask 261120   ;;  %s288_s1 = inlined_call_operand.vmem [shape: bf16[32,128], index: 1, kind: input, shape index: {}]   ;;  %s289_s3 = inlined_call_operand.vmem [shape: f32[128,128], index: 3, kind: input, shape index: {}]   ;;  %s290_s2 = inlined_call_operand.vmem [shape: f32[3,128], index: 2, kind: input, shape index: {}]   ;;  %s291_s0 = inlined_call_operand.vmem [shape: bf16[2,8,32], index: 0, kind: input, shape index: {}]   ;;  %s292_s4 = inlined_call_operand.vmem [shape: bf16[2,8,128], index: 4, kind: output, shape index: {}]  }
   0x1   :  { %v185_v0 = vld [vmem:[%s288_s1 + $0x8] sm:$0xff]  ;;  %v83_v1 = vld [vmem:[%s289_s3 + $0x78] sm:$0xff]  ;;  %v82_v2 = vld [vmem:[%s289_s3 + $0x70] sm:$0xff] }
   0x2   :  { %53 = vmatpush.bf16.msra.mxu0 %v185_v0  ;;  %v184_v3 = vld [vmem:[%s288_s1] sm:$0xff]  ;;  %84 = vmatpush.msra.mxu1 %v83_v1  ;;  %v81_v4 = vld [vmem:[%s289_s3 + $0x68] sm:$0xff]  ;;  %v79_v7 = vld [vmem:[%s289_s3 + $0x58] sm:$0xff] }
   0x3   :  { %113 = vmatpush.msra.mxu2 %v83_v1  ;;  %v183_v5 = vld [vmem:[%s291_s0] sm:$0xff]  ;;  %v78_v8 = vld [vmem:[%s289_s3 + $0x50] sm:$0xff]  ;;  %v77_v9 = vld [vmem:[%s289_s3 + $0x48] sm:$0xff] }
   0x4   :  { %85 = vmatpush.msra.mxu1 %v82_v2  ;;  %v80_v6 = vld [vmem:[%s289_s3 + $0x60] sm:$0xff]  ;;  %v75_v11 = vld [vmem:[%s289_s3 + $0x38] sm:$0xff]  ;;  %v74_v12 = vld [vmem:[%s289_s3 + $0x30] sm:$0xff] }
   0x5   :  { %114 = vmatpush.msra.mxu2 %v82_v2  ;;  %v76_v10 = vld [vmem:[%s289_s3 + $0x40] sm:$0xff]  ;;  %v73_v13 = vld [vmem:[%s289_s3 + $0x28] sm:$0xff]  ;;  %v71_v15 = vld [vmem:[%s289_s3 + $0x18] sm:$0xff] }
   0x6   :  { %54 = vmatpush.bf16.msra.mxu0 %v184_v3  ;;  %86 = vmatpush.msra.mxu1 %v81_v4  ;;  %v72_v14 = vld [vmem:[%s289_s3 + $0x20] sm:$0xff]  ;;  %v70_v16 = vld [vmem:[%s289_s3 + $0x10] sm:$0xff]  ;;  %v69_v17 = vld [vmem:[%s289_s3 + $0x8] sm:$0xff] }
   0x7   :  { %115 = vmatpush.msra.mxu2 %v81_v4  ;;  %v68_v18 = vld [vmem:[%s289_s3] sm:$0xff] }
   0x8   :  { %87 = vmatpush.msra.mxu1 %v80_v6  ;;  %v191_v20 = vld [vmem:[%s290_s2] ss:$0 sm:$0xff]  ;;  %v138_v53 = vld [vmem:[%s290_s2 + $0x1] sm:$0x1]  ;;  %v151_v57 = vld [vmem:[%s290_s2 + $0x2] sm:$0x1] }
   0x9   :  { %182 = vmatmul.msk.bf16.vlgmr.msra.gmra.mxu0 %vm43_vm0, %v183_v5  ;;  %116 = vmatpush.msra.mxu2 %v80_v6 }
   0xa   :  { %88 = vmatpush.msra.mxu1 %v79_v7 }
   0xb   :  { %117 = vmatpush.msra.mxu2 %v79_v7 }
   0xc   :  { %89 = vmatpush.msra.mxu1 %v78_v8 }
   0xd   :  { %118 = vmatpush.msra.mxu2 %v78_v8 }
   0xe   :  { %90 = vmatpush.msra.mxu1 %v77_v9 }
   0xf   :  { %119 = vmatpush.msra.mxu2 %v77_v9 }
  0x10   :  { %91 = vmatpush.msra.mxu1 %v76_v10 }
  0x11   :  { %120 = vmatpush.msra.mxu2 %v76_v10 }
  0x12   :  { %92 = vmatpush.msra.mxu1 %v75_v11 }
  0x13   :  { %121 = vmatpush.msra.mxu2 %v75_v11 }
  0x14   :  { %93 = vmatpush.msra.mxu1 %v74_v12 }
  0x15   :  { %122 = vmatpush.msra.mxu2 %v74_v12 }
  0x16   :  { %94 = vmatpush.msra.mxu1 %v73_v13 }
  0x17   :  { %123 = vmatpush.msra.mxu2 %v73_v13 }
  0x18   :  { %95 = vmatpush.msra.mxu1 %v72_v14 }
  0x19   :  { %124 = vmatpush.msra.mxu2 %v72_v14 }
  0x1a   :  { %96 = vmatpush.msra.mxu1 %v71_v15 }
  0x1b   :  { %125 = vmatpush.msra.mxu2 %v71_v15 }
  0x1c   :  { %97 = vmatpush.msra.mxu1 %v70_v16 }
  0x1d   :  { %126 = vmatpush.msra.mxu2 %v70_v16 }
  0x1e   :  { %98 = vmatpush.msra.mxu1 %v69_v17 }
  0x1f   :  { %127 = vmatpush.msra.mxu2 %v69_v17 }
  0x20   :  { %99 = vmatpush.msra.mxu1 %v68_v18 }
  0x21   :  { %128 = vmatpush.msra.mxu2 %v68_v18 }
  0x86   :  { %v56_v19 = vpop.f32.mrf.mxu0 }
  0x87   :  { %v57_v21 = vadd.f32 %v191_v20, %v56_v19 }
  0x89   :  { %v104_v24 = vmul.f32 %v57_v21, %v57_v21 }
  0x8e   :  { %v58_v22 = vpop.f32.mrf.mxu0 }
  0x8f   :  { %v59_v23 = vadd.f32 %v191_v20, %v58_v22 }
  0x91   :  { %v61_v25 = vadd.f32 %v59_v23, %v57_v21  ;;  %v105_v26 = vmul.f32 %v59_v23, %v59_v23 }
  0x93   :  { %v62_v27 = vrot.slane %v61_v25, 4  ;;  %v106_v28 = vadd.f32 %v105_v26, %v104_v24 }
  0x95   :  { %v63_v29 = vadd.f32 %v62_v27, %v61_v25  ;;  %v107_v30 = vrot.slane %v106_v28, 4 }
  0x97   :  { %v64_v31 = vrot.slane %v63_v29, 2  ;;  %v108_v32 = vadd.f32 %v107_v30, %v106_v28 }
  0x99   :  { %v65_v33 = vadd.f32 %v64_v31, %v63_v29  ;;  %v109_v34 = vrot.slane %v108_v32, 2 }
  0x9b   :  { %v66_v35 = vrot.slane %v65_v33, 1  ;;  %v110_v36 = vadd.f32 %v109_v34, %v108_v32 }
  0x9d   :  { %v67_v37 = vadd.f32 %v66_v35, %v65_v33  ;;  %v111_v38 = vrot.slane %v110_v36, 1 }
  0x9f   :  { %100 = vmatmul.f32.vlgmr.msra.gmra.mxu1 %v67_v37  ;;  %v112_v39 = vadd.f32 %v111_v38, %v110_v36 }
  0xa1   :  { %129 = vmatmul.f32.vlgmr.msra.gmra.mxu2 %v112_v39 }
 0x11c   :  { %v101_v40 = vpop.f32.mrf.mxu1 }
 0x11d   :  { %v133_v41 = vmul.f32 0.0078125, %v101_v40 }
 0x11f   :  { %v135_v43 = vmul.f32 %v133_v41, %v133_v41 }
 0x124   :  { %v130_v42 = vpop.f32.mrf.mxu2 }
 0x125   :  { %v134_v44 = vmul.f32 0.0078125, %v130_v42 }
 0x127   :  { %v136_v45 = vsub.f32 %v134_v44, %v135_v43 }
 0x129   :  { %v137_v46 = vmax.f32 %v136_v45, 0.0 }
 0x12b   :  { %v139_v47 = vadd.f32 1e-05, %v137_v46 }
 0x12d   :  { %192 = vrsqrt.f32 %v139_v47  ;;  %vm146_vm2 = vweird.f32 %v139_v47 }
 0x133   :  { %v193_v48 = vpop.eup %192 }
 0x134   :  { %v141_v49 = vmul.f32 %v193_v48, %v139_v47  ;;  %vm147_vm1 = vweird.f32 %v193_v48 }
 0x135   :  { %vm148_vm3 = vmor %vm146_vm2, %vm147_vm1 }
 0x136   :  { %v142_v50 = vmul.f32 %v193_v48, %v141_v49 }
 0x138   :  { %v143_v51 = vmul.f32 0.5, %v142_v50 }
 0x13a   :  { %v144_v52 = vsub.f32 1.5, %v143_v51 }
 0x13c   :  { %v145_v54 = vmul.f32 %v193_v48, %v144_v52 }
 0x13e   :  { %v149_v55 = vsel %vm148_vm3, %v193_v48, %v145_v54 }
 0x13f   :  { %v150_v56 = vmul.f32 %v149_v55, %v138_v53 }
 0x141   :  { %v152_v58 = vmul.f32 %v150_v56, %v133_v41  ;;  %v154_v59 = vperm.slane %v150_v56, 0 }
 0x143   :  { %v153_v60 = vsub.f32 %v151_v57, %v152_v58  ;;  %v155_v61 = vmul.f32 %v154_v59, %v57_v21  ;;  %v156_v62 = vmul.f32 %v154_v59, %v59_v23 }
 0x145   :  { %v157_v63 = vperm.slane %v153_v60, 0 }
 0x147   :  { %v158_v0 = vadd.f32 %v157_v63, %v155_v61  ;;  %v159_v1 = vadd.f32 %v157_v63, %v156_v62 }
 0x149   :  { %v160_v2 = vmax.f32 %v158_v0, 0.0  ;;  %v161_v3 = vmax.f32 %v159_v1, 0.0 }
 0x14b   :  { %v189_v4 = vpack.c.bf16 %v161_v3, %v160_v2 }
 0x14d   :  { %190 = vst [vmem:[%s292_s4] sm:$0xff] %v189_v4  }

// kernel: encoder_forward.7
= control target key start
LH: loop header
LB: loop body
LE: loop exit
PB: predicated region body
PF: predicated region fallthrough
CT: control target
= control target key end

     0   :  { %vm60_vm0 = vcmask 1042432   ;;  %vm61_vm1 = vcmask 1046532   ;;  %vm25_vm2 = vsmask.f32 3328  ;;  %vm26_vm4 = vsmask.f32 7440  ;;  %s927_s0 = inlined_call_operand.vmem [shape: bf16[2,10,160], index: 0, kind: input, shape index: {}]   ;;  %s928_s1 = inlined_call_operand.vmem [shape: bf16[480,128], index: 1, kind: input, shape index: {}]   ;;  %s929_s2 = inlined_call_operand.vmem [shape: f32[3,128], index: 2, kind: input, shape index: {}]   ;;  %s930_s3 = inlined_call_operand.vmem [shape: f32[128,128], index: 3, kind: input, shape index: {}]   ;;  %s931_s4 = inlined_call_operand.vmem [shape: bf16[2,8,128], index: 4, kind: input, shape index: {}]   ;;  %s932_s5 = inlined_call_operand.vmem [shape: bf16[2,8,128], index: 5, kind: output, shape index: {}]  }
   0x1   :  { %v21_v0 = vld [vmem:[%s927_s0] sm:$0xff]  ;;  %v22_v1 = vld [vmem:[%s927_s0 + $0x8] sm:$0x11]  ;;  %v23_v2 = vld [vmem:[%s927_s0 + $0x10] sm:$0xff]  ;;  %s706_s21 = smov 64   ;;  %s707_s13 = smov 32  }
   0x2   :  { %v24_v3 = vld [vmem:[%s927_s0 + $0x18] sm:$0x11]  ;;  %vm62_vm3 = vmor %vm60_vm0, %vm61_vm1  ;;  %v529_v4 = vrot.slane %v21_v0, 9  ;;  %v65_v5 = vrot.slane %v22_v1, 5  ;;  %v530_v6 = vrot.slane %v23_v2, 9  ;;  %v29_v7 = vshrl.u32 %v21_v0, 16 }
   0x3   :  { %v69_v8 = vrot.slane %v24_v3, 5  ;;  %v32_v9 = vshll.u32 %v21_v0, 16  ;;  %v38_v10 = vshll.u32 %v22_v1, 16  ;;  %v43_v11 = vshrl.u32 %v23_v2, 16  ;;  %v669_v12 = vld [vmem:[%s928_s1 + $0x38] sm:$0xff]  ;;  %v668_v21 = vld [vmem:[%s928_s1 + $0x30] sm:$0xff]  ;;  %vm773_vm5 = vmor %vm25_vm2, %vm26_vm4 }
   0x4   :  { %v677_v13 = vld [vmem:[%s928_s1 + $0x78] sm:$0xff]  ;;  %v66_v14 = vsel %vm62_vm3, %v529_v4, %v65_v5  ;;  %v31_v15 = vrot.slane %v29_v7, 4  ;;  %v46_v16 = vshll.u32 %v23_v2, 16  ;;  %v52_v20 = vshll.u32 %v24_v3, 16  ;;  %358 = vmatpush.bf16.msra.mxu0 %v669_v12  ;;  %v676_v22 = vld [vmem:[%s928_s1 + $0x70] sm:$0xff]  ;;  %v691_v26 = vld [vmem:[%s928_s1 + $0xe8] sm:$0xff] }
   0x5   :  { %v70_v17 = vsel %vm62_vm3, %v530_v6, %v69_v8  ;;  %v90_v18 = vunpack.c.l.b16 %v66_v14  ;;  %v34_v19 = vrot.slane %v32_v9, 5  ;;  %372 = vmatpush.bf16.msra.mxu1 %v677_v13  ;;  %v685_v23 = vld [vmem:[%s928_s1 + $0xb8] sm:$0xff]  ;;  %v45_v25 = vrot.slane %v43_v11, 4  ;;  %v684_v30 = vld [vmem:[%s928_s1 + $0xb0] sm:$0xff]  ;;  %402 = vmatpush.bf16.msra.mxu3 %v691_v26  ;;  %v690_v33 = vld [vmem:[%s928_s1 + $0xe0] sm:$0xff] }
   0x6   :  { %v92_v24 = vunpack.c.l.b16 %v70_v17  ;;  %v40_v28 = vrot.slane %v38_v10, 5  ;;  %v48_v29 = vrot.slane %v46_v16, 5  ;;  %386 = vmatpush.bf16.msra.mxu2 %v685_v23  ;;  %v54_v36 = vrot.slane %v52_v20, 5  ;;  %v667_v37 = vld [vmem:[%s928_s1 + $0x28] sm:$0xff]  ;;  %v689_v45 = vld [vmem:[%s928_s1 + $0xd8] sm:$0xff]  ;;  %v666_v47 = vld [vmem:[%s928_s1 + $0x20] sm:$0xff] }
   0x7   :  { %v35_v27 = vor.u32 %v34_v19, %v31_v15  ;;  %v675_v38 = vld [vmem:[%s928_s1 + $0x68] sm:$0xff]  ;;  %v91_v39 = vunpack.c.h.b16 %v66_v14  ;;  %v93_v40 = vunpack.c.h.b16 %v70_v17  ;;  %v674_v48 = vld [vmem:[%s928_s1 + $0x60] sm:$0xff]  ;;  %v688_v53 = vld [vmem:[%s928_s1 + $0xd0] sm:$0xff]  ;;  %vm88_vm6 = vcmask 261120  }
   0x8   :  { %v94_v31 = vpack.c.b16 %v92_v24, %v90_v18  ;;  %v49_v35 = vor.u32 %v48_v29, %v45_v25  ;;  %359 = vmatpush.bf16.msra.mxu0 %v668_v21  ;;  %v683_v43 = vld [vmem:[%s928_s1 + $0xa8] sm:$0xff]  ;;  %v682_v51 = vld [vmem:[%s928_s1 + $0xa0] sm:$0xff]  ;;  %v665_v54 = vld [vmem:[%s928_s1 + $0x18] sm:$0xff]  ;;  %vm100_vm7 = vcmask 523264   ;;  %vm354_vm8 = vcmask 785408  }
   0x9   :  { %v36_v34 = vrot.slane %v35_v27, 4  ;;  %373 = vmatpush.bf16.msra.mxu1 %v676_v22  ;;  %403 = vmatpush.bf16.msra.mxu3 %v690_v33  ;;  %v95_v50 = vpack.c.b16 %v93_v40, %v91_v39  ;;  %v673_v55 = vld [vmem:[%s928_s1 + $0x58] sm:$0xff]  ;;  %v664_v58 = vld [vmem:[%s928_s1 + $0x10] sm:$0xff]  ;;  %v663_v61 = vld [vmem:[%s928_s1 + $0x8] sm:$0xff] }
   0xa   :  { %96 = vrot.lane.b32.xlu1 %v94_v31, %s706_s21  ;;  %v50_v42 = vrot.slane %v49_v35, 4  ;;  %387 = vmatpush.bf16.msra.mxu2 %v684_v30  ;;  %v672_v59 = vld [vmem:[%s928_s1 + $0x50] sm:$0xff]  ;;  %v671_v62 = vld [vmem:[%s928_s1 + $0x48] sm:$0xff]  ;;  %v681_v63 = vld [vmem:[%s928_s1 + $0x98] sm:$0xff] }
   0xb   :  { %v41_v41 = vsel %vm773_vm5, %v36_v34, %v40_v28  ;;  %v662_v0 = vld [vmem:[%s928_s1] sm:$0xff]  ;;  %v687_v1 = vld [vmem:[%s928_s1 + $0xc8] sm:$0xff]  ;;  %v661_v4 = vld [vmem:[%s927_s0 + $0xc] sm:$0xf0] }
   0xc   :  { %v78_v44 = vunpack.c.l.b16 %v41_v41  ;;  %v55_v46 = vsel %vm773_vm5, %v50_v42, %v54_v36  ;;  %360 = vmatpush.bf16.msra.mxu0 %v667_v37  ;;  %v79_v56 = vunpack.c.h.b16 %v41_v41  ;;  %v533_v2 = vld [vmem:[%s927_s0] sm:$0xf]  ;;  %v680_v6 = vld [vmem:[%s928_s1 + $0x90] sm:$0xff]  ;;  %v679_v8 = vld [vmem:[%s928_s1 + $0x88] sm:$0xff] }
   0xd   :  { %374 = vmatpush.bf16.msra.mxu1 %v675_v38  ;;  %v80_v49 = vunpack.c.l.b16 %v55_v46  ;;  %404 = vmatpush.bf16.msra.mxu3 %v689_v45  ;;  %v81_v57 = vunpack.c.h.b16 %v55_v46  ;;  %v670_v3 = vld [vmem:[%s928_s1 + $0x40] sm:$0xff]  ;;  %v534_v5 = vor.u32 %v661_v4, %v533_v2  ;;  %v535_v12 = vld [vmem:[%s927_s0 + $0x10] sm:$0xf0]  ;;  %v436_v21 = vld [vmem:[%s930_s3 + $0x78] sm:$0xff] }
   0xe   :  { %388 = vmatpush.bf16.msra.mxu2 %v683_v43  ;;  %v686_v7 = vld [vmem:[%s928_s1 + $0xc0] sm:$0xff]  ;;  %v435_v22 = vld [vmem:[%s930_s3 + $0x70] sm:$0xff]  ;;  %v434_v23 = vld [vmem:[%s930_s3 + $0x68] sm:$0xff] }
   0xf   :  { %v82_v52 = vpack.c.b16 %v80_v49, %v78_v44  ;;  %v83_v60 = vpack.c.b16 %v81_v57, %v79_v56  ;;  %v678_v9 = vld [vmem:[%s928_s1 + $0x80] sm:$0xff]  ;;  %v432_v25 = vld [vmem:[%s930_s3 + $0x58] sm:$0xff]  ;;  %v431_v26 = vld [vmem:[%s930_s3 + $0x50] sm:$0xff] }
  0x10   :  { %361 = vmatpush.bf16.msra.mxu0 %v666_v47  ;;  %v660_v11 = vld [vmem:[%s927_s0 + $0x4] sm:$0xf]  ;;  %v430_v27 = vld [vmem:[%s930_s3 + $0x48] sm:$0xff]  ;;  %v428_v29 = vld [vmem:[%s930_s3 + $0x38] sm:$0xff] }
  0x11   :  { %375 = vmatpush.bf16.msra.mxu1 %v674_v48  ;;  %84 = vrot.lane.b32.xlu0 %v82_v52, %s707_s13  ;;  %v538_v13 = vor.u32 %v660_v11, %v535_v12  ;;  %v433_v24 = vld [vmem:[%s930_s3 + $0x60] sm:$0xff]  ;;  %v427_v30 = vld [vmem:[%s930_s3 + $0x30] sm:$0xff]  ;;  %v426_v31 = vld [vmem:[%s930_s3 + $0x28] sm:$0xff] }
  0x12   :  { %98 = vrot.lane.b32.xlu1 %v95_v50, %s706_s21  ;;  %389 = vmatpush.bf16.msra.mxu2 %v682_v51  ;;  %v429_v28 = vld [vmem:[%s930_s3 + $0x40] sm:$0xff]  ;;  %v424_v33 = vld [vmem:[%s930_s3 + $0x18] sm:$0xff]  ;;  %v423_v34 = vld [vmem:[%s930_s3 + $0x10] sm:$0xff] }
  0x13   :  { %405 = vmatpush.bf16.msra.mxu3 %v688_v53  ;;  %v425_v32 = vld [vmem:[%s930_s3 + $0x20] sm:$0xff]  ;;  %v422_v36 = vld [vmem:[%s930_s3 + $0x8] sm:$0xff] }
  0x14   :  { %362 = vmatpush.bf16.msra.mxu0 %v665_v54  ;;  %v421_v37 = vld [vmem:[%s930_s3] sm:$0xff] }
  0x15   :  { %376 = vmatpush.bf16.msra.mxu1 %v673_v55  ;;  %v703_v39 = vld [vmem:[%s929_s2] ss:$0 sm:$0xff] }
  0x16   :  { %390 = vmatpush.bf16.msra.mxu2 %v681_v63 }
  0x17   :  { %406 = vmatpush.bf16.msra.mxu3 %v687_v1 }
  0x18   :  { %363 = vmatpush.bf16.msra.mxu0 %v664_v58 }
  0x19   :  { %377 = vmatpush.bf16.msra.mxu1 %v672_v59  ;;  %86 = vrot.lane.b32.xlu0 %v83_v60, %s707_s13 }
  0x1a   :  { %391 = vmatpush.bf16.msra.mxu2 %v680_v6 }
  0x1b   :  { %407 = vmatpush.bf16.msra.mxu3 %v686_v7 }
  0x1c   :  { %364 = vmatpush.bf16.msra.mxu0 %v663_v61 }
  0x1d   :  { %378 = vmatpush.bf16.msra.mxu1 %v671_v62 }
  0x1e   :  { %392 = vmatpush.bf16.msra.mxu2 %v679_v8 }
  0x1f   :  { %437 = vmatpush.msrb.mxu3 %v436_v21 }
  0x20   :  { %365 = vmatpush.bf16.msra.mxu0 %v662_v0 }
  0x21   :  { %379 = vmatpush.bf16.msra.mxu1 %v670_v3  ;;  %438 = vmatpush.msrb.mxu3 %v435_v22 }
  0x22   :  { %393 = vmatpush.bf16.msra.mxu2 %v678_v9 }
  0x23   :  { %366 = vmatmul.bf16.vlgmr.msra.gmra.mxu0 %v534_v5  ;;  %439 = vmatpush.msrb.mxu3 %v434_v23 }
  0x24   :  { %466 = vmatpush.msrb.mxu0 %v436_v21 }
  0x25   :  { %440 = vmatpush.msrb.mxu3 %v433_v24 }
  0x26   :  { %467 = vmatpush.msrb.mxu0 %v435_v22 }
  0x27   :  { %441 = vmatpush.msrb.mxu3 %v432_v25 }
  0x28   :  { %468 = vmatpush.msrb.mxu0 %v434_v23  ;;  %v504_v23 = vld [vmem:[%s929_s2 + $0x2] sm:$0x1] }
  0x29   :  { %442 = vmatpush.msrb.mxu3 %v431_v26 }
  0x2a   :  { %469 = vmatpush.msrb.mxu0 %v433_v24 }
  0x2b   :  { %443 = vmatpush.msrb.mxu3 %v430_v27 }
  0x2c   :  { %470 = vmatpush.msrb.mxu0 %v432_v25 }
  0x2d   :  { %444 = vmatpush.msrb.mxu3 %v429_v28 }
  0x2e   :  { %471 = vmatpush.msrb.mxu0 %v431_v26 }
  0x2f   :  { %445 = vmatpush.msrb.mxu3 %v428_v29 }
  0x30   :  { %472 = vmatpush.msrb.mxu0 %v430_v27  ;;  %v693_v27 = vld [vmem:[%s931_s4] sm:$0xff]  }
  0x31   :  { %446 = vmatpush.msrb.mxu3 %v427_v30 }
  0x32   :  { %473 = vmatpush.msrb.mxu0 %v429_v28 }
  0x33   :  { %447 = vmatpush.msrb.mxu3 %v426_v31 }
  0x34   :  { %474 = vmatpush.msrb.mxu0 %v428_v29 }
  0x35   :  { %448 = vmatpush.msrb.mxu3 %v425_v32 }
  0x36   :  { %475 = vmatpush.msrb.mxu0 %v427_v30 }
  0x37   :  { %449 = vmatpush.msrb.mxu3 %v424_v33 }
  0x38   :  { %476 = vmatpush.msrb.mxu0 %v426_v31 }
  0x39   :  { %450 = vmatpush.msrb.mxu3 %v423_v34 }
  0x3a   :  { %477 = vmatpush.msrb.mxu0 %v425_v32 }
  0x3b   :  { %451 = vmatpush.msrb.mxu3 %v422_v36 }
  0x3c   :  { %478 = vmatpush.msrb.mxu0 %v424_v33  ;;  %v694_v33 = vunpack.c.l.bf16 %v693_v27 }
  0x3d   :  { %452 = vmatpush.msrb.mxu3 %v421_v37 }
  0x3e   :  { %479 = vmatpush.msrb.mxu0 %v423_v34  ;;  %v695_v34 = vunpack.c.h.bf16 %v693_v27 }
  0x40   :  { %480 = vmatpush.msrb.mxu0 %v422_v36 }
  0x42   :  { %481 = vmatpush.msrb.mxu0 %v421_v37 }
  0x7c   :  { %v97_v10 = vpop.permute.xlu1 %96 }
  0x83   :  { %v85_v14 = vpop.permute.xlu0 %84 }
  0x84   :  { %v99_v15 = vpop.permute.xlu1 %98  ;;  %v105_v16 = vsel %vm88_vm6, %v538_v13, %v85_v14 }
  0x85   :  { %v101_v17 = vsel %vm100_vm7, %v97_v10, %v99_v15  ;;  %380 = vmatmul.bf16.vlgmr.msra.gmra.mxu1 %v105_v16 }
  0x86   :  { %659 = vmatmul.msk.bf16.vlgmr.msra.gmra.mxu3 %vm354_vm8, %v101_v17 }
  0x8b   :  { %v87_v18 = vpop.permute.xlu0 %86 }
  0x8c   :  { %v89_v19 = vsel %vm88_vm6, %v85_v14, %v87_v18 }
  0x8d   :  { %v110_v20 = vsel %vm100_vm7, %v89_v19, %v97_v10  ;;  %v491_v19 = vld [vmem:[%s929_s2 + $0x1] sm:$0x1] }
  0x8e   :  { %394 = vmatmul.bf16.vlgmr.msra.gmra.mxu2 %v110_v20 }
  0xa0   :  { %v367_v35 = vpop.f32.mrf.mxu0 }
  0xa1   :  { %v368_v40 = vadd.f32 %v703_v39, %v367_v35 }
  0xa8   :  { %v369_v41 = vpop.f32.mrf.mxu0 }
  0xa9   :  { %v370_v45 = vadd.f32 %v703_v39, %v369_v41 }
 0x102   :  { %v381_v38 = vpop.f32.mrf.mxu1 }
 0x103   :  { %v382_v44 = vadd.f32 %v381_v38, %v368_v40 }
 0x109   :  { %v409_v42 = vpop.f32.mrf.mxu3 }
 0x10a   :  { %v383_v46 = vpop.f32.mrf.mxu1 }
 0x10b   :  { %v384_v48 = vadd.f32 %v383_v46, %v370_v45 }
 0x111   :  { %v395_v43 = vpop.f32.mrf.mxu2  ;;  %v411_v52 = vpop.f32.mrf.mxu3 }
 0x112   :  { %v396_v47 = vadd.f32 %v395_v43, %v382_v44 }
 0x114   :  { %v410_v50 = vadd.f32 %v409_v42, %v396_v47 }
 0x116   :  { %v457_v54 = vmul.f32 %v410_v50, %v410_v50 }
 0x119   :  { %v397_v49 = vpop.f32.mrf.mxu2 }
 0x11a   :  { %v398_v51 = vadd.f32 %v397_v49, %v384_v48 }
 0x11c   :  { %v412_v53 = vadd.f32 %v411_v52, %v398_v51 }
 0x11e   :  { %v414_v55 = vadd.f32 %v412_v53, %v410_v50  ;;  %v458_v56 = vmul.f32 %v412_v53, %v412_v53 }
 0x120   :  { %v415_v57 = vrot.slane %v414_v55, 4  ;;  %v459_v58 = vadd.f32 %v458_v56, %v457_v54 }
 0x122   :  { %v416_v59 = vadd.f32 %v415_v57, %v414_v55  ;;  %v460_v60 = vrot.slane %v459_v58, 4 }
 0x124   :  { %v417_v61 = vrot.slane %v416_v59, 2  ;;  %v461_v62 = vadd.f32 %v460_v60, %v459_v58 }
 0x126   :  { %v418_v63 = vadd.f32 %v417_v61, %v416_v59  ;;  %v462_v0 = vrot.slane %v461_v62, 2 }
 0x128   :  { %v419_v1 = vrot.slane %v418_v63, 1  ;;  %v463_v2 = vadd.f32 %v462_v0, %v461_v62 }
 0x12a   :  { %v420_v3 = vadd.f32 %v419_v1, %v418_v63  ;;  %v464_v4 = vrot.slane %v463_v2, 1 }
 0x12c   :  { %453 = vmatmul.f32.vlgmr.msrb.gmra.mxu3 %v420_v3  ;;  %v465_v5 = vadd.f32 %v464_v4, %v463_v2 }
 0x12e   :  { %482 = vmatmul.f32.vlgmr.msrb.gmra.mxu0 %v465_v5 }
 0x1ab   :  { %v483_v6 = vpop.f32.mrf.mxu0 }
 0x1ac   :  { %v487_v9 = vmul.f32 0.0078125, %v483_v6 }
 0x1af   :  { %v454_v7 = vpop.f32.mrf.mxu3 }
 0x1b0   :  { %v486_v8 = vmul.f32 0.0078125, %v454_v7 }
 0x1b2   :  { %v488_v10 = vmul.f32 %v486_v8, %v486_v8 }
 0x1b4   :  { %v489_v11 = vsub.f32 %v487_v9, %v488_v10 }
 0x1b6   :  { %v490_v12 = vmax.f32 %v489_v11, 0.0 }
 0x1b8   :  { %v492_v13 = vadd.f32 1e-05, %v490_v12 }
 0x1ba   :  { %704 = vrsqrt.f32 %v492_v13  ;;  %vm499_vm10 = vweird.f32 %v492_v13 }
 0x1c0   :  { %v705_v14 = vpop.eup %704 }
 0x1c1   :  { %v494_v15 = vmul.f32 %v705_v14, %v492_v13  ;;  %vm500_vm9 = vweird.f32 %v705_v14 }
 0x1c2   :  { %vm501_vm11 = vmor %vm499_vm10, %vm500_vm9 }
 0x1c3   :  { %v495_v16 = vmul.f32 %v705_v14, %v494_v15 }
 0x1c5   :  { %v496_v17 = vmul.f32 0.5, %v495_v16 }
 0x1c7   :  { %v497_v18 = vsub.f32 1.5, %v496_v17 }
 0x1c9   :  { %v498_v20 = vmul.f32 %v705_v14, %v497_v18 }
 0x1cb   :  { %v502_v21 = vsel %vm501_vm11, %v705_v14, %v498_v20 }
 0x1cc   :  { %v503_v22 = vmul.f32 %v502_v21, %v491_v19 }
 0x1ce   :  { %v505_v24 = vmul.f32 %v503_v22, %v486_v8  ;;  %v507_v25 = vperm.slane %v503_v22, 0 }
 0x1d0   :  { %v506_v26 = vsub.f32 %v504_v23, %v505_v24  ;;  %v508_v28 = vmul.f32 %v507_v25, %v410_v50  ;;  %v509_v29 = vmul.f32 %v507_v25, %v412_v53 }
 0x1d2   :  { %v510_v30 = vperm.slane %v506_v26, 0 }
 0x1d4   :  { %v511_v31 = vadd.f32 %v510_v30, %v508_v28  ;;  %v512_v32 = vadd.f32 %v510_v30, %v509_v29 }
 0x1d6   :  { %v513_v35 = vmax.f32 %v511_v31, 0.0  ;;  %v514_v36 = vmax.f32 %v512_v32, 0.0 }
 0x1d8   :  { %v519_v37 = vadd.f32 %v694_v33, %v513_v35  ;;  %v520_v38 = vadd.f32 %v695_v34, %v514_v36 }
 0x1da   :  { %v699_v39 = vpack.c.bf16 %v520_v38, %v519_v37 }
 0x1dc   :  { %700 = vst [vmem:[%s932_s5] sm:$0xff] %v699_v39  }

// kernel: encoder_forward.8
= control target key start
LH: loop header
LB: loop body
LE: loop exit
PB: predicated region body
PF: predicated region fallthrough
CT: control target
= control target key end

     0   :  { %vm57_vm0 = vcmask 1042432   ;;  %vm58_vm1 = vcmask 1046532   ;;  %vm22_vm2 = vsmask.f32 3328  ;;  %vm23_vm4 = vsmask.f32 7440  ;;  %s906_s0 = inlined_call_operand.vmem [shape: bf16[2,10,160], index: 0, kind: input, shape index: {}]   ;;  %s907_s1 = inlined_call_operand.vmem [shape: bf16[480,128], index: 1, kind: input, shape index: {}]   ;;  %s908_s2 = inlined_call_operand.vmem [shape: f32[3,128], index: 2, kind: input, shape index: {}]   ;;  %s909_s3 = inlined_call_operand.vmem [shape: f32[128,128], index: 3, kind: input, shape index: {}]   ;;  %s910_s4 = inlined_call_operand.vmem [shape: bf16[2,8,128], index: 4, kind: output, shape index: {}]  }
   0x1   :  { %v18_v0 = vld [vmem:[%s906_s0] sm:$0xff]  ;;  %v19_v1 = vld [vmem:[%s906_s0 + $0x8] sm:$0x11]  ;;  %v20_v2 = vld [vmem:[%s906_s0 + $0x10] sm:$0xff]  ;;  %s693_s17 = smov 64   ;;  %s694_s8 = smov 32  }
   0x2   :  { %v21_v3 = vld [vmem:[%s906_s0 + $0x18] sm:$0x11]  ;;  %vm59_vm3 = vmor %vm57_vm0, %vm58_vm1  ;;  %v520_v4 = vrot.slane %v18_v0, 9  ;;  %v62_v5 = vrot.slane %v19_v1, 5  ;;  %v521_v6 = vrot.slane %v20_v2, 9  ;;  %v26_v7 = vshrl.u32 %v18_v0, 16 }
   0x3   :  { %v66_v8 = vrot.slane %v21_v3, 5  ;;  %v29_v9 = vshll.u32 %v18_v0, 16  ;;  %v35_v10 = vshll.u32 %v19_v1, 16  ;;  %v40_v11 = vshrl.u32 %v20_v2, 16  ;;  %v660_v12 = vld [vmem:[%s907_s1 + $0x38] sm:$0xff]  ;;  %v659_v21 = vld [vmem:[%s907_s1 + $0x30] sm:$0xff]  ;;  %vm755_vm5 = vmor %vm22_vm2, %vm23_vm4 }
   0x4   :  { %v668_v13 = vld [vmem:[%s907_s1 + $0x78] sm:$0xff]  ;;  %v63_v14 = vsel %vm59_vm3, %v520_v4, %v62_v5  ;;  %v28_v15 = vrot.slane %v26_v7, 4  ;;  %v43_v16 = vshll.u32 %v20_v2, 16  ;;  %v49_v20 = vshll.u32 %v21_v3, 16  ;;  %355 = vmatpush.bf16.msra.mxu0 %v660_v12  ;;  %v667_v22 = vld [vmem:[%s907_s1 + $0x70] sm:$0xff]  ;;  %v682_v26 = vld [vmem:[%s907_s1 + $0xe8] sm:$0xff] }
   0x5   :  { %v67_v17 = vsel %vm59_vm3, %v521_v6, %v66_v8  ;;  %v87_v18 = vunpack.c.l.b16 %v63_v14  ;;  %v31_v19 = vrot.slane %v29_v9, 5  ;;  %369 = vmatpush.bf16.msra.mxu1 %v668_v13  ;;  %v676_v23 = vld [vmem:[%s907_s1 + $0xb8] sm:$0xff]  ;;  %v42_v25 = vrot.slane %v40_v11, 4  ;;  %v675_v30 = vld [vmem:[%s907_s1 + $0xb0] sm:$0xff]  ;;  %399 = vmatpush.bf16.msra.mxu3 %v682_v26  ;;  %v681_v33 = vld [vmem:[%s907_s1 + $0xe0] sm:$0xff] }
   0x6   :  { %v89_v24 = vunpack.c.l.b16 %v67_v17  ;;  %v37_v28 = vrot.slane %v35_v10, 5  ;;  %v45_v29 = vrot.slane %v43_v16, 5  ;;  %383 = vmatpush.bf16.msra.mxu2 %v676_v23  ;;  %v51_v36 = vrot.slane %v49_v20, 5  ;;  %v658_v37 = vld [vmem:[%s907_s1 + $0x28] sm:$0xff]  ;;  %v680_v45 = vld [vmem:[%s907_s1 + $0xd8] sm:$0xff]  ;;  %v657_v47 = vld [vmem:[%s907_s1 + $0x20] sm:$0xff] }
   0x7   :  { %v32_v27 = vor.u32 %v31_v19, %v28_v15  ;;  %v666_v38 = vld [vmem:[%s907_s1 + $0x68] sm:$0xff]  ;;  %v88_v39 = vunpack.c.h.b16 %v63_v14  ;;  %v90_v40 = vunpack.c.h.b16 %v67_v17  ;;  %v665_v48 = vld [vmem:[%s907_s1 + $0x60] sm:$0xff]  ;;  %v679_v53 = vld [vmem:[%s907_s1 + $0xd0] sm:$0xff]  ;;  %vm85_vm6 = vcmask 261120  }
   0x8   :  { %v91_v31 = vpack.c.b16 %v89_v24, %v87_v18  ;;  %v46_v35 = vor.u32 %v45_v29, %v42_v25  ;;  %356 = vmatpush.bf16.msra.mxu0 %v659_v21  ;;  %v674_v43 = vld [vmem:[%s907_s1 + $0xa8] sm:$0xff]  ;;  %v673_v51 = vld [vmem:[%s907_s1 + $0xa0] sm:$0xff]  ;;  %v656_v54 = vld [vmem:[%s907_s1 + $0x18] sm:$0xff]  ;;  %vm97_vm7 = vcmask 523264   ;;  %vm351_vm8 = vcmask 785408  }
   0x9   :  { %v33_v34 = vrot.slane %v32_v27, 4  ;;  %370 = vmatpush.bf16.msra.mxu1 %v667_v22  ;;  %400 = vmatpush.bf16.msra.mxu3 %v681_v33  ;;  %v92_v50 = vpack.c.b16 %v90_v40, %v88_v39  ;;  %v664_v55 = vld [vmem:[%s907_s1 + $0x58] sm:$0xff]  ;;  %v655_v58 = vld [vmem:[%s907_s1 + $0x10] sm:$0xff]  ;;  %v654_v61 = vld [vmem:[%s907_s1 + $0x8] sm:$0xff] }
   0xa   :  { %93 = vrot.lane.b32.xlu1 %v91_v31, %s693_s17  ;;  %v47_v42 = vrot.slane %v46_v35, 4  ;;  %384 = vmatpush.bf16.msra.mxu2 %v675_v30  ;;  %v663_v59 = vld [vmem:[%s907_s1 + $0x50] sm:$0xff]  ;;  %v662_v62 = vld [vmem:[%s907_s1 + $0x48] sm:$0xff]  ;;  %v672_v63 = vld [vmem:[%s907_s1 + $0x98] sm:$0xff] }
   0xb   :  { %v38_v41 = vsel %vm755_vm5, %v33_v34, %v37_v28  ;;  %v653_v0 = vld [vmem:[%s907_s1] sm:$0xff]  ;;  %v678_v1 = vld [vmem:[%s907_s1 + $0xc8] sm:$0xff]  ;;  %v652_v4 = vld [vmem:[%s906_s0 + $0xc] sm:$0xf0] }
   0xc   :  { %v75_v44 = vunpack.c.l.b16 %v38_v41  ;;  %v52_v46 = vsel %vm755_vm5, %v47_v42, %v51_v36  ;;  %357 = vmatpush.bf16.msra.mxu0 %v658_v37  ;;  %v76_v56 = vunpack.c.h.b16 %v38_v41  ;;  %v524_v2 = vld [vmem:[%s906_s0] sm:$0xf]  ;;  %v671_v6 = vld [vmem:[%s907_s1 + $0x90] sm:$0xff]  ;;  %v670_v8 = vld [vmem:[%s907_s1 + $0x88] sm:$0xff] }
   0xd   :  { %371 = vmatpush.bf16.msra.mxu1 %v666_v38  ;;  %v77_v49 = vunpack.c.l.b16 %v52_v46  ;;  %401 = vmatpush.bf16.msra.mxu3 %v680_v45  ;;  %v78_v57 = vunpack.c.h.b16 %v52_v46  ;;  %v661_v3 = vld [vmem:[%s907_s1 + $0x40] sm:$0xff]  ;;  %v525_v5 = vor.u32 %v652_v4, %v524_v2  ;;  %v526_v12 = vld [vmem:[%s906_s0 + $0x10] sm:$0xf0]  ;;  %v433_v21 = vld [vmem:[%s909_s3 + $0x78] sm:$0xff] }
   0xe   :  { %385 = vmatpush.bf16.msra.mxu2 %v674_v43  ;;  %v677_v7 = vld [vmem:[%s907_s1 + $0xc0] sm:$0xff]  ;;  %v432_v22 = vld [vmem:[%s909_s3 + $0x70] sm:$0xff]  ;;  %v431_v23 = vld [vmem:[%s909_s3 + $0x68] sm:$0xff] }
   0xf   :  { %v79_v52 = vpack.c.b16 %v77_v49, %v75_v44  ;;  %v80_v60 = vpack.c.b16 %v78_v57, %v76_v56  ;;  %v669_v9 = vld [vmem:[%s907_s1 + $0x80] sm:$0xff]  ;;  %v429_v25 = vld [vmem:[%s909_s3 + $0x58] sm:$0xff]  ;;  %v428_v26 = vld [vmem:[%s909_s3 + $0x50] sm:$0xff] }
  0x10   :  { %358 = vmatpush.bf16.msra.mxu0 %v657_v47  ;;  %v651_v11 = vld [vmem:[%s906_s0 + $0x4] sm:$0xf]  ;;  %v427_v27 = vld [vmem:[%s909_s3 + $0x48] sm:$0xff]  ;;  %v425_v29 = vld [vmem:[%s909_s3 + $0x38] sm:$0xff] }
  0x11   :  { %372 = vmatpush.bf16.msra.mxu1 %v665_v48  ;;  %81 = vrot.lane.b32.xlu0 %v79_v52, %s694_s8  ;;  %v529_v13 = vor.u32 %v651_v11, %v526_v12  ;;  %v430_v24 = vld [vmem:[%s909_s3 + $0x60] sm:$0xff]  ;;  %v424_v30 = vld [vmem:[%s909_s3 + $0x30] sm:$0xff]  ;;  %v423_v31 = vld [vmem:[%s909_s3 + $0x28] sm:$0xff] }
  0x12   :  { %95 = vrot.lane.b32.xlu1 %v92_v50, %s693_s17  ;;  %386 = vmatpush.bf16.msra.mxu2 %v673_v51  ;;  %v426_v28 = vld [vmem:[%s909_s3 + $0x40] sm:$0xff]  ;;  %v421_v33 = vld [vmem:[%s909_s3 + $0x18] sm:$0xff]  ;;  %v420_v34 = vld [vmem:[%s909_s3 + $0x10] sm:$0xff] }
  0x13   :  { %402 = vmatpush.bf16.msra.mxu3 %v679_v53  ;;  %v422_v32 = vld [vmem:[%s909_s3 + $0x20] sm:$0xff]  ;;  %v419_v36 = vld [vmem:[%s909_s3 + $0x8] sm:$0xff] }
  0x14   :  { %359 = vmatpush.bf16.msra.mxu0 %v656_v54  ;;  %v418_v37 = vld [vmem:[%s909_s3] sm:$0xff] }
  0x15   :  { %373 = vmatpush.bf16.msra.mxu1 %v664_v55  ;;  %v690_v39 = vld [vmem:[%s908_s2] ss:$0 sm:$0xff] }
  0x16   :  { %387 = vmatpush.bf16.msra.mxu2 %v672_v63 }
  0x17   :  { %403 = vmatpush.bf16.msra.mxu3 %v678_v1 }
  0x18   :  { %360 = vmatpush.bf16.msra.mxu0 %v655_v58 }
  0x19   :  { %374 = vmatpush.bf16.msra.mxu1 %v663_v59  ;;  %83 = vrot.lane.b32.xlu0 %v80_v60, %s694_s8 }
  0x1a   :  { %388 = vmatpush.bf16.msra.mxu2 %v671_v6 }
  0x1b   :  { %404 = vmatpush.bf16.msra.mxu3 %v677_v7 }
  0x1c   :  { %361 = vmatpush.bf16.msra.mxu0 %v654_v61 }
  0x1d   :  { %375 = vmatpush.bf16.msra.mxu1 %v662_v62 }
  0x1e   :  { %389 = vmatpush.bf16.msra.mxu2 %v670_v8 }
  0x1f   :  { %434 = vmatpush.msrb.mxu3 %v433_v21 }
  0x20   :  { %362 = vmatpush.bf16.msra.mxu0 %v653_v0 }
  0x21   :  { %376 = vmatpush.bf16.msra.mxu1 %v661_v3  ;;  %435 = vmatpush.msrb.mxu3 %v432_v22 }
  0x22   :  { %390 = vmatpush.bf16.msra.mxu2 %v669_v9 }
  0x23   :  { %363 = vmatmul.bf16.vlgmr.msra.gmra.mxu0 %v525_v5  ;;  %436 = vmatpush.msrb.mxu3 %v431_v23 }
  0x24   :  { %463 = vmatpush.msrb.mxu0 %v433_v21 }
  0x25   :  { %437 = vmatpush.msrb.mxu3 %v430_v24 }
  0x26   :  { %464 = vmatpush.msrb.mxu0 %v432_v22 }
  0x27   :  { %438 = vmatpush.msrb.mxu3 %v429_v25 }
  0x28   :  { %465 = vmatpush.msrb.mxu0 %v431_v23  ;;  %v501_v23 = vld [vmem:[%s908_s2 + $0x2] sm:$0x1] }
  0x29   :  { %439 = vmatpush.msrb.mxu3 %v428_v26 }
  0x2a   :  { %466 = vmatpush.msrb.mxu0 %v430_v24 }
  0x2b   :  { %440 = vmatpush.msrb.mxu3 %v427_v27 }
  0x2c   :  { %467 = vmatpush.msrb.mxu0 %v429_v25 }
  0x2d   :  { %441 = vmatpush.msrb.mxu3 %v426_v28 }
  0x2e   :  { %468 = vmatpush.msrb.mxu0 %v428_v26 }
  0x2f   :  { %442 = vmatpush.msrb.mxu3 %v425_v29 }
  0x30   :  { %469 = vmatpush.msrb.mxu0 %v427_v27 }
  0x31   :  { %443 = vmatpush.msrb.mxu3 %v424_v30 }
  0x32   :  { %470 = vmatpush.msrb.mxu0 %v426_v28 }
  0x33   :  { %444 = vmatpush.msrb.mxu3 %v423_v31 }
  0x34   :  { %471 = vmatpush.msrb.mxu0 %v425_v29 }
  0x35   :  { %445 = vmatpush.msrb.mxu3 %v422_v32 }
  0x36   :  { %472 = vmatpush.msrb.mxu0 %v424_v30 }
  0x37   :  { %446 = vmatpush.msrb.mxu3 %v421_v33 }
  0x38   :  { %473 = vmatpush.msrb.mxu0 %v423_v31 }
  0x39   :  { %447 = vmatpush.msrb.mxu3 %v420_v34 }
  0x3a   :  { %474 = vmatpush.msrb.mxu0 %v422_v32 }
  0x3b   :  { %448 = vmatpush.msrb.mxu3 %v419_v36 }
  0x3c   :  { %475 = vmatpush.msrb.mxu0 %v421_v33 }
  0x3d   :  { %449 = vmatpush.msrb.mxu3 %v418_v37 }
  0x3e   :  { %476 = vmatpush.msrb.mxu0 %v420_v34 }
  0x40   :  { %477 = vmatpush.msrb.mxu0 %v419_v36 }
  0x42   :  { %478 = vmatpush.msrb.mxu0 %v418_v37 }
  0x7c   :  { %v94_v10 = vpop.permute.xlu1 %93 }
  0x83   :  { %v82_v14 = vpop.permute.xlu0 %81 }
  0x84   :  { %v96_v15 = vpop.permute.xlu1 %95  ;;  %v102_v16 = vsel %vm85_vm6, %v529_v13, %v82_v14 }
  0x85   :  { %v98_v17 = vsel %vm97_vm7, %v94_v10, %v96_v15  ;;  %377 = vmatmul.bf16.vlgmr.msra.gmra.mxu1 %v102_v16 }
  0x86   :  { %650 = vmatmul.msk.bf16.vlgmr.msra.gmra.mxu3 %vm351_vm8, %v98_v17 }
  0x8b   :  { %v84_v18 = vpop.permute.xlu0 %83 }
  0x8c   :  { %v86_v19 = vsel %vm85_vm6, %v82_v14, %v84_v18 }
  0x8d   :  { %v107_v20 = vsel %vm97_vm7, %v86_v19, %v94_v10  ;;  %v488_v19 = vld [vmem:[%s908_s2 + $0x1] sm:$0x1] }
  0x8e   :  { %391 = vmatmul.bf16.vlgmr.msra.gmra.mxu2 %v107_v20 }
  0xa0   :  { %v364_v35 = vpop.f32.mrf.mxu0 }
  0xa1   :  { %v365_v40 = vadd.f32 %v690_v39, %v364_v35 }
  0xa8   :  { %v366_v41 = vpop.f32.mrf.mxu0 }
  0xa9   :  { %v367_v45 = vadd.f32 %v690_v39, %v366_v41 }
 0x102   :  { %v378_v38 = vpop.f32.mrf.mxu1 }
 0x103   :  { %v379_v44 = vadd.f32 %v378_v38, %v365_v40 }
 0x109   :  { %v406_v42 = vpop.f32.mrf.mxu3 }
 0x10a   :  { %v380_v46 = vpop.f32.mrf.mxu1 }
 0x10b   :  { %v381_v48 = vadd.f32 %v380_v46, %v367_v45 }
 0x111   :  { %v392_v43 = vpop.f32.mrf.mxu2  ;;  %v408_v52 = vpop.f32.mrf.mxu3 }
 0x112   :  { %v393_v47 = vadd.f32 %v392_v43, %v379_v44 }
 0x114   :  { %v407_v50 = vadd.f32 %v406_v42, %v393_v47 }
 0x116   :  { %v454_v54 = vmul.f32 %v407_v50, %v407_v50 }
 0x119   :  { %v394_v49 = vpop.f32.mrf.mxu2 }
 0x11a   :  { %v395_v51 = vadd.f32 %v394_v49, %v381_v48 }
 0x11c   :  { %v409_v53 = vadd.f32 %v408_v52, %v395_v51 }
 0x11e   :  { %v411_v55 = vadd.f32 %v409_v53, %v407_v50  ;;  %v455_v56 = vmul.f32 %v409_v53, %v409_v53 }
 0x120   :  { %v412_v57 = vrot.slane %v411_v55, 4  ;;  %v456_v58 = vadd.f32 %v455_v56, %v454_v54 }
 0x122   :  { %v413_v59 = vadd.f32 %v412_v57, %v411_v55  ;;  %v457_v60 = vrot.slane %v456_v58, 4 }
 0x124   :  { %v414_v61 = vrot.slane %v413_v59, 2  ;;  %v458_v62 = vadd.f32 %v457_v60, %v456_v58 }
 0x126   :  { %v415_v63 = vadd.f32 %v414_v61, %v413_v59  ;;  %v459_v0 = vrot.slane %v458_v62, 2 }
 0x128   :  { %v416_v1 = vrot.slane %v415_v63, 1  ;;  %v460_v2 = vadd.f32 %v459_v0, %v458_v62 }
 0x12a   :  { %v417_v3 = vadd.f32 %v416_v1, %v415_v63  ;;  %v461_v4 = vrot.slane %v460_v2, 1 }
 0x12c   :  { %450 = vmatmul.f32.vlgmr.msrb.gmra.mxu3 %v417_v3  ;;  %v462_v5 = vadd.f32 %v461_v4, %v460_v2 }
 0x12e   :  { %479 = vmatmul.f32.vlgmr.msrb.gmra.mxu0 %v462_v5 }
 0x1ab   :  { %v480_v6 = vpop.f32.mrf.mxu0 }
 0x1ac   :  { %v484_v9 = vmul.f32 0.0078125, %v480_v6 }
 0x1af   :  { %v451_v7 = vpop.f32.mrf.mxu3 }
 0x1b0   :  { %v483_v8 = vmul.f32 0.0078125, %v451_v7 }
 0x1b2   :  { %v485_v10 = vmul.f32 %v483_v8, %v483_v8 }
 0x1b4   :  { %v486_v11 = vsub.f32 %v484_v9, %v485_v10 }
 0x1b6   :  { %v487_v12 = vmax.f32 %v486_v11, 0.0 }
 0x1b8   :  { %v489_v13 = vadd.f32 1e-05, %v487_v12 }
 0x1ba   :  { %691 = vrsqrt.f32 %v489_v13  ;;  %vm496_vm10 = vweird.f32 %v489_v13 }
 0x1c0   :  { %v692_v14 = vpop.eup %691 }
 0x1c1   :  { %v491_v15 = vmul.f32 %v692_v14, %v489_v13  ;;  %vm497_vm9 = vweird.f32 %v692_v14 }
 0x1c2   :  { %vm498_vm11 = vmor %vm496_vm10, %vm497_vm9 }
 0x1c3   :  { %v492_v16 = vmul.f32 %v692_v14, %v491_v15 }
 0x1c5   :  { %v493_v17 = vmul.f32 0.5, %v492_v16 }
 0x1c7   :  { %v494_v18 = vsub.f32 1.5, %v493_v17 }
 0x1c9   :  { %v495_v20 = vmul.f32 %v692_v14, %v494_v18 }
 0x1cb   :  { %v499_v21 = vsel %vm498_vm11, %v692_v14, %v495_v20 }
 0x1cc   :  { %v500_v22 = vmul.f32 %v499_v21, %v488_v19 }
 0x1ce   :  { %v502_v24 = vmul.f32 %v500_v22, %v483_v8  ;;  %v504_v25 = vperm.slane %v500_v22, 0 }
 0x1d0   :  { %v503_v26 = vsub.f32 %v501_v23, %v502_v24  ;;  %v505_v27 = vmul.f32 %v504_v25, %v407_v50  ;;  %v506_v28 = vmul.f32 %v504_v25, %v409_v53 }
 0x1d2   :  { %v507_v29 = vperm.slane %v503_v26, 0 }
 0x1d4   :  { %v508_v30 = vadd.f32 %v507_v29, %v505_v27  ;;  %v509_v31 = vadd.f32 %v507_v29, %v506_v28 }
 0x1d6   :  { %v510_v32 = vmax.f32 %v508_v30, 0.0  ;;  %v511_v33 = vmax.f32 %v509_v31, 0.0 }
 0x1d8   :  { %v686_v34 = vpack.c.bf16 %v511_v33, %v510_v32 }
 0x1da   :  { %687 = vst [vmem:[%s910_s4] sm:$0xff] %v686_v34  }

</bundles_post_ra>
